<compile_context>
chip_gen: v7x
topology: tpu7x:2x2x1
jax: 0.10.0
libtpu: 0.0.40
codegen_flags: <defaults>
</compile_context>

<pallas_src>
import functools
import math

import numpy as np

import jax
import jax.numpy as jnp
from jax.experimental import pallas as pl
from jax.experimental.pallas import tpu as pltpu

_EPS = 1e-5
_VMEM_LIMIT = 32 * 1024 * 1024


# --------------------------------------------------------------------------------------
# Compile-time constant matrices (fold upsample + F.pad + conv zero-pad + concat).
# --------------------------------------------------------------------------------------
def _bilinear_matrix(n_in, n_out):
    """(n_out, n_in) bilinear interpolation matrix, align_corners=True semantics."""
    a = np.zeros((n_out, n_in), dtype=np.float32)
    for o in range(n_out):
        src = 0.0 if (n_out == 1 or n_in == 1) else o * (n_in - 1) / (n_out - 1)
        lo = int(math.floor(src))
        hi = min(lo + 1, n_in - 1)
        w_hi = src - lo
        a[o, lo] += 1.0 - w_hi
        a[o, hi] += w_hi
    return a


def _axis_interp_matrix(n_in, n_up, n_img, total):
    """(total, n_in): rows are padded coordinates.  The image occupies rows [1, 1+n_img);
    within it, the upsampled x1 occupies [1+off, 1+off+n_up) (F.pad), off=(n_img-n_up)//2.
    Everything else (conv halo / F.pad region) is zero."""
    up = _bilinear_matrix(n_in, n_up)
    off = (n_img - n_up) // 2
    a = np.zeros((total, n_in), dtype=np.float32)
    for r in range(total):
        i = r - 1 - off
        if 0 <= i < n_up and 1 <= r < 1 + n_img:
            a[r] = up[i]
    return a


def _axis_shift_matrix(n_img, total):
    """(total, n_img) selection matrix placing the image at padded offset 1."""
    p = np.zeros((total, n_img), dtype=np.float32)
    for i in range(n_img):
        p[1 + i, i] = 1.0
    return p


def _fold_bn(w, b, gamma, beta, mean, var, eps=_EPS):
    """Fold eval-mode BatchNorm (+ conv bias) into per-channel scale/shift and
    reshape the conv weight to tap-major (9, Cout, Cin)."""
    cout, cin = w.shape[0], w.shape[1]
    scale = gamma / jnp.sqrt(var + eps)                       # (Cout,)
    shift = beta + scale * (b - mean)                         # (Cout,)
    w9 = jnp.transpose(w.reshape(cout, cin, 9), (2, 0, 1))    # (9, Cout, Cin)
    return w9, scale.reshape(cout, 1), shift.reshape(cout, 1)


# --------------------------------------------------------------------------------------
# Kernels.
# --------------------------------------------------------------------------------------
def _prepare_kernel(x2_ref, x1_ref, ph_ref, pwT_ref, ah_ref, awT_ref, o_ref):
    """Per image: o = concat([pad(x2), pad(F.pad(bilinear_up(x1)))], channel) with
    shape (Cin, Hp, Wp).  Padding / upsampling / placement are encoded in the small
    constant matrices, so every store is a full lane-dense channel plane."""
    c2 = x2_ref.shape[0]
    c1 = x1_ref.shape[0]
    f32 = jnp.float32
    for c in range(c2):                                   # padded copy of x2
        t = jnp.dot(ph_ref[...], x2_ref[c], preferred_element_type=f32)
        o_ref[c] = jnp.dot(t, pwT_ref[...], preferred_element_type=f32)
    for c in range(c1):                                   # upsampled + padded x1
        t = jnp.dot(ah_ref[...], x1_ref[c], preferred_element_type=f32)
        o_ref[c2 + c] = jnp.dot(t, awT_ref[...], preferred_element_type=f32)


def _double_conv_kernel(xf_ref, w1_ref, s1_ref, b1_ref, w2_ref, s2_ref, b2_ref,
                        mask_ref, o_ref, h_ref, *, wp, m):
    """Fused (conv3x3 -> BN -> ReLU) x2 on a flattened, spatially padded image.

    xf_ref : (Cin, Hp*Wp)  padded input, spatial flattened on the lane axis
    w*_ref : (9, Cout, Cin) tap-major weights;  s*/b*: folded BN scale/shift (Cout, 1)
    mask   : (1, M) valid-column mask (zeroes the 2 junk columns per row)
    h_ref  : VMEM scratch (Cmid, Hp*Wp) holding conv1's output in padded layout
    o_ref  : (Cout, M) with M = H*Wp
    """
    f32 = jnp.float32
    cmid = w1_ref.shape[1]
    cout = w2_ref.shape[1]

    # conv1 + BN1 + ReLU: 9 shifted lane-dense matmuls, f32 accumulation.
    acc = jnp.zeros((cmid, m), f32)
    for ky in range(3):
        for kx in range(3):
            off = ky * wp + kx
            acc = acc + jnp.dot(w1_ref[ky * 3 + kx], xf_ref[:, off:off + m],
                                preferred_element_type=f32)
    h = jnp.maximum(acc * s1_ref[...] + b1_ref[...], 0.0)
    h = h * mask_ref[...]

    # Re-pad in VMEM: zero borders, valid pixels shifted by one padded row + col.
    h_ref[...] = jnp.zeros_like(h_ref)
    h_ref[:, wp + 1:wp + 1 + m] = h

    # conv2 + BN2 + ReLU, same 9-tap structure, reading the VMEM scratch.
    acc2 = jnp.zeros((cout, m), f32)
    for ky in range(3):
        for kx in range(3):
            off = ky * wp + kx
            acc2 = acc2 + jnp.dot(w2_ref[ky * 3 + kx], h_ref[:, off:off + m],
                                  preferred_element_type=f32)
    y = jnp.maximum(acc2 * s2_ref[...] + b2_ref[...], 0.0)
    o_ref[...] = y.astype(o_ref.dtype)


# --------------------------------------------------------------------------------------
# Wrapper (Up.forward).
# --------------------------------------------------------------------------------------
@jax.jit
def up_forward(x1, x2, params):
    """Up(bilinear=True).forward(x1, x2) -> (N, Cout, H2, W2)."""
    n, c1, h1, w1 = x1.shape
    _, c2, h2, w2 = x2.shape
    cin = c1 + c2
    cmid = params["w1"].shape[0]
    cout = params["w2"].shape[0]

    hp, wp = h2 + 3, w2 + 2          # +1 top/left, +2/+1 bottom/right (tap headroom)
    l = hp * wp                      # flattened padded spatial length
    m = h2 * wp                      # flattened output strip length

    # Constant matrices (trace-time numpy -> folded constants).
    a_h = jnp.asarray(_axis_interp_matrix(h1, 2 * h1, h2, hp))        # (Hp, H1)
    a_wT = jnp.asarray(_axis_interp_matrix(w1, 2 * w1, w2, wp).T)     # (W1, Wp)
    p_h = jnp.asarray(_axis_shift_matrix(h2, hp))                     # (Hp, H2)
    p_wT = jnp.asarray(_axis_shift_matrix(w2, wp).T)                  # (W2, Wp)
    col = np.arange(m, dtype=np.int64) % wp
    mask = jnp.asarray((col < w2).astype(np.float32).reshape(1, m))   # (1, M)

    # ---- kernel 1: upsample + pad + concat -> (N, Cin, Hp, Wp) ----
    xcat = pl.pallas_call(
        _prepare_kernel,
        out_shape=jax.ShapeDtypeStruct((n, cin, hp, wp), jnp.float32),
        grid_spec=pltpu.PrefetchScalarGridSpec(
            num_scalar_prefetch=0,
            grid=(n,),
            in_specs=[
                pl.BlockSpec((None, c2, h2, w2), lambda i: (i, 0, 0, 0)),
                pl.BlockSpec((None, c1, h1, w1), lambda i: (i, 0, 0, 0)),
                pl.BlockSpec((hp, h2), lambda i: (0, 0)),
                pl.BlockSpec((w2, wp), lambda i: (0, 0)),
                pl.BlockSpec((hp, h1), lambda i: (0, 0)),
                pl.BlockSpec((w1, wp), lambda i: (0, 0)),
            ],
            out_specs=pl.BlockSpec((None, cin, hp, wp), lambda i: (i, 0, 0, 0)),
        ),
        compiler_params=pltpu.CompilerParams(
            dimension_semantics=("parallel",),
            vmem_limit_bytes=_VMEM_LIMIT,
        ),
        cost_estimate=pl.CostEstimate(
            flops=2 * n * (c2 * (hp * h2 * w2 + hp * w2 * wp)
                           + c1 * (hp * h1 * w1 + hp * w1 * wp)),
            transcendentals=0,
            bytes_accessed=4 * n * (c2 * h2 * w2 + c1 * h1 * w1 + cin * l),
        ),
    )(x2, x1, p_h, p_wT, a_h, a_wT)

    xcat_flat = xcat.reshape(n, cin, l)   # free reshape: collapses contiguous minor dims

    w1_9, s1, b1 = _fold_bn(params["w1"], params["b1"], params["g1"],
                            params["beta1"], params["m1"], params["v1"])
    w2_9, s2, b2 = _fold_bn(params["w2"], params["b2"], params["g2"],
                            params["beta2"], params["m2"], params["v2"])

    # ---- kernel 2: fused DoubleConv -> (N, Cout, H2*Wp) ----
    out_flat = pl.pallas_call(
        functools.partial(_double_conv_kernel, wp=wp, m=m),
        out_shape=jax.ShapeDtypeStruct((n, cout, m), jnp.float32),
        grid_spec=pltpu.PrefetchScalarGridSpec(
            num_scalar_prefetch=0,
            grid=(n,),
            in_specs=[
                pl.BlockSpec((None, cin, l), lambda i: (i, 0, 0)),
                pl.BlockSpec((9, cmid, cin), lambda i: (0, 0, 0)),
                pl.BlockSpec((cmid, 1), lambda i: (0, 0)),
                pl.BlockSpec((cmid, 1), lambda i: (0, 0)),
                pl.BlockSpec((9, cout, cmid), lambda i: (0, 0, 0)),
                pl.BlockSpec((cout, 1), lambda i: (0, 0)),
                pl.BlockSpec((cout, 1), lambda i: (0, 0)),
                pl.BlockSpec((1, m), lambda i: (0, 0)),
            ],
            out_specs=pl.BlockSpec((None, cout, m), lambda i: (i, 0, 0)),
            scratch_shapes=[pltpu.VMEM((cmid, l), jnp.float32)],
        ),
        compiler_params=pltpu.CompilerParams(
            dimension_semantics=("parallel",),
            vmem_limit_bytes=_VMEM_LIMIT,
        ),
        cost_estimate=pl.CostEstimate(
            flops=2 * 9 * n * m * (cin * cmid + cmid * cout),
            transcendentals=0,
            bytes_accessed=4 * (n * (cin * l + cout * m)
                                + 9 * (cin * cmid + cmid * cout)),
        ),
    )(xcat_flat, w1_9, s1, b1, w2_9, s2, b2, mask)

    # (N, Cout, H2*Wp) -> (N, Cout, H2, Wp) is free; drop the 2 junk columns per row.
    return out_flat.reshape(n, cout, h2, wp)[:, :, :, :w2]


# --------------------------------------------------------------------------------------
# Pure-JAX reference (independent implementation of the PyTorch forward).
# --------------------------------------------------------------------------------------
def _ref_up_forward(x1, x2, p):
    n, c1, h1, w1 = x1.shape
    ho, wo = 2 * h1, 2 * w1

    def src(n_out, n_in):
        if n_out == 1 or n_in == 1:
            return jnp.zeros((n_out,), jnp.float32)
        return jnp.arange(n_out, dtype=jnp.float32) * (n_in - 1) / (n_out - 1)

    ys, xs = src(ho, h1), src(wo, w1)
    y0 = jnp.floor(ys).astype(jnp.int32)
    y1 = jnp.minimum(y0 + 1, h1 - 1)
    wy = ys - y0
    x0 = jnp.floor(xs).astype(jnp.int32)
    x1i = jnp.minimum(x0 + 1, w1 - 1)
    wx = xs - x0
    g = (x1[:, :, y0, :] * (1.0 - wy)[None, None, :, None]
         + x1[:, :, y1, :] * wy[None, None, :, None])
    up = (g[:, :, :, x0] * (1.0 - wx)[None, None, None, :]
          + g[:, :, :, x1i] * wx[None, None, None, :])

    h2, w2 = x2.shape[2], x2.shape[3]
    dy, dx = h2 - ho, w2 - wo
    up = jnp.pad(up, ((0, 0), (0, 0), (dy // 2, dy - dy // 2), (dx // 2, dx - dx // 2)))
    x = jnp.concatenate([x2, up], axis=1)

    def conv_bn_relu(z, w, b, gamma, beta, mean, var):
        y = jax.lax.conv_general_dilated(
            z, w, (1, 1), ((1, 1), (1, 1)),
            dimension_numbers=("NCHW", "OIHW", "NCHW"),
            precision=jax.lax.Precision.HIGHEST)
        y = y + b[None, :, None, None]
        y = (gamma[None, :, None, None] * (y - mean[None, :, None, None])
             / jnp.sqrt(var[None, :, None, None] + _EPS) + beta[None, :, None, None])
        return jnp.maximum(y, 0.0)

    h = conv_bn_relu(x, p["w1"], p["b1"], p["g1"], p["beta1"], p["m1"], p["v1"])
    return conv_bn_relu(h, p["w2"], p["b2"], p["g2"], p["beta2"], p["m2"], p["v2"])


# --------------------------------------------------------------------------------------
if __name__ == "__main__":
    key = jax.random.PRNGKey(0)
    ks = jax.random.split(key, 14)

    N = 2
    in_ch, out_ch = 8, 4            # Up(in_channels=8, out_channels=4, bilinear=True)
    c1 = c2 = in_ch // 2            # x1 / x2 channel counts (U-Net convention)
    cmid = in_ch // 2               # DoubleConv mid_channels = in_channels // 2
    H1 = W1 = 8
    H2 = W2 = 16

    x1 = jax.random.normal(ks[0], (N, c1, H1, W1), jnp.float32)
    x2 = jax.random.normal(ks[1], (N, c2, H2, W2), jnp.float32)

    params = {
        "w1": jax.random.normal(ks[2], (cmid, in_ch, 3, 3), jnp.float32) * 0.1,
        "b1": jax.random.normal(ks[3], (cmid,), jnp.float32) * 0.1,
        "g1": 1.0 + 0.1 * jax.random.normal(ks[4], (cmid,), jnp.float32),
        "beta1": 0.1 * jax.random.normal(ks[5], (cmid,), jnp.float32),
        "m1": 0.1 * jax.random.normal(ks[6], (cmid,), jnp.float32),
        "v1": jax.random.uniform(ks[7], (cmid,), jnp.float32, 0.5, 1.5),
        "w2": jax.random.normal(ks[8], (out_ch, cmid, 3, 3), jnp.float32) * 0.1,
        "b2": jax.random.normal(ks[9], (out_ch,), jnp.float32) * 0.1,
        "g2": 1.0 + 0.1 * jax.random.normal(ks[10], (out_ch,), jnp.float32),
        "beta2": 0.1 * jax.random.normal(ks[11], (out_ch,), jnp.float32),
        "m2": 0.1 * jax.random.normal(ks[12], (out_ch,), jnp.float32),
        "v2": jax.random.uniform(ks[13], (out_ch,), jnp.float32, 0.5, 1.5),
    }

    y = up_forward(x1, x2, params)
    jax.block_until_ready(y)

    y_ref = _ref_up_forward(x1, x2, params)
    assert y.shape == (N, out_ch, H2, W2)
    err = float(jnp.max(jnp.abs(y - y_ref)))
    assert err < 2e-4, f"max abs error {err}"

    print("KERNEL_OK")
</pallas_src>

<mosaic_0001>
module attributes {stable_mosaic.version = 11 : i64} {
  func.func @_prepare_kernel(%arg0: i32, %arg1: memref<1x4x16x16xf32, #tpu.memory_space<vmem>>, %arg2: memref<1x4x8x8xf32, #tpu.memory_space<vmem>>, %arg3: memref<19x16xf32, #tpu.memory_space<vmem>>, %arg4: memref<16x18xf32, #tpu.memory_space<vmem>>, %arg5: memref<19x8xf32, #tpu.memory_space<vmem>>, %arg6: memref<8x18xf32, #tpu.memory_space<vmem>>, %arg7: memref<1x8x19x18xf32, #tpu.memory_space<vmem>>) attributes {dimension_semantics = [#tpu.dimension_semantics<parallel>], iteration_bounds = array<i64: 2>, scalar_prefetch = 0 : i64, scratch_operands = 0 : i64, tpu.core_type = #tpu.core_type<tc>, window_params = [{transform_indices = @transform_0, window_bounds = array<i64: 1, 4, 16, 16>}, {transform_indices = @transform_1, window_bounds = array<i64: 1, 4, 8, 8>}, {pipeline_mode = #tpu.pipeline_mode<synchronous>, transform_indices = @transform_2, window_bounds = array<i64: 19, 16>}, {pipeline_mode = #tpu.pipeline_mode<synchronous>, transform_indices = @transform_3, window_bounds = array<i64: 16, 18>}, {pipeline_mode = #tpu.pipeline_mode<synchronous>, transform_indices = @transform_4, window_bounds = array<i64: 19, 8>}, {pipeline_mode = #tpu.pipeline_mode<synchronous>, transform_indices = @transform_5, window_bounds = array<i64: 8, 18>}, {transform_indices = @transform_6, window_bounds = array<i64: 1, 8, 19, 18>}]} {
    %c0 = arith.constant 0 : index
    %c0_0 = arith.constant 0 : index
    %0 = vector.load %arg3[%c0, %c0_0] : memref<19x16xf32, #tpu.memory_space<vmem>>, vector<19x16xf32>
    %c0_1 = arith.constant 0 : index
    %c0_2 = arith.constant 0 : index
    %c0_3 = arith.constant 0 : index
    %c0_4 = arith.constant 0 : index
    %1 = vector.load %arg1[%c0_1, %c0_2, %c0_3, %c0_4] : memref<1x4x16x16xf32, #tpu.memory_space<vmem>>, vector<1x1x16x16xf32>
    %2 = vector.shape_cast %1 : vector<1x1x16x16xf32> to vector<16x16xf32>
    %cst = arith.constant dense<0.000000e+00> : vector<19x16xf32>
    %3 = tpu.matmul %0, %2, %cst {dimension_numbers = #tpu.dot_dimension_numbers<[1], [0], [0], [1], [0, 0, 1, 1], [], []>} : vector<19x16xf32>, vector<16x16xf32>, vector<19x16xf32> -> vector<19x16xf32>
    %c0_5 = arith.constant 0 : index
    %c0_6 = arith.constant 0 : index
    %4 = vector.load %arg4[%c0_5, %c0_6] : memref<16x18xf32, #tpu.memory_space<vmem>>, vector<16x18xf32>
    %cst_7 = arith.constant dense<0.000000e+00> : vector<19x18xf32>
    %5 = tpu.matmul %3, %4, %cst_7 {dimension_numbers = #tpu.dot_dimension_numbers<[1], [0], [0], [1], [0, 0, 1, 1], [], []>} : vector<19x16xf32>, vector<16x18xf32>, vector<19x18xf32> -> vector<19x18xf32>
    %c0_8 = arith.constant 0 : index
    %c0_9 = arith.constant 0 : index
    %c0_10 = arith.constant 0 : index
    %c0_11 = arith.constant 0 : index
    %6 = vector.load %arg7[%c0_8, %c0_9, %c0_10, %c0_11] : memref<1x8x19x18xf32, #tpu.memory_space<vmem>>, vector<1x1x19x18xf32>
    %7 = vector.shape_cast %6 : vector<1x1x19x18xf32> to vector<19x18xf32>
    %8 = vector.shape_cast %5 : vector<19x18xf32> to vector<1x1x19x18xf32>
    tpu.vector_store %arg7[%c0_8, %c0_9, %c0_10, %c0_11], %8 {strides = array<i32>} : memref<1x8x19x18xf32, #tpu.memory_space<vmem>>, vector<1x1x19x18xf32>,
    %c0_12 = arith.constant 0 : index
    %c0_13 = arith.constant 0 : index
    %9 = vector.load %arg3[%c0_12, %c0_13] : memref<19x16xf32, #tpu.memory_space<vmem>>, vector<19x16xf32>
    %c0_14 = arith.constant 0 : index
    %c1 = arith.constant 1 : index
    %c0_15 = arith.constant 0 : index
    %c0_16 = arith.constant 0 : index
    %10 = vector.load %arg1[%c0_14, %c1, %c0_15, %c0_16] : memref<1x4x16x16xf32, #tpu.memory_space<vmem>>, vector<1x1x16x16xf32>
    %11 = vector.shape_cast %10 : vector<1x1x16x16xf32> to vector<16x16xf32>
    %cst_17 = arith.constant dense<0.000000e+00> : vector<19x16xf32>
    %12 = tpu.matmul %9, %11, %cst_17 {dimension_numbers = #tpu.dot_dimension_numbers<[1], [0], [0], [1], [0, 0, 1, 1], [], []>} : vector<19x16xf32>, vector<16x16xf32>, vector<19x16xf32> -> vector<19x16xf32>
    %c0_18 = arith.constant 0 : index
    %c0_19 = arith.constant 0 : index
    %13 = vector.load %arg4[%c0_18, %c0_19] : memref<16x18xf32, #tpu.memory_space<vmem>>, vector<16x18xf32>
    %cst_20 = arith.constant dense<0.000000e+00> : vector<19x18xf32>
    %14 = tpu.matmul %12, %13, %cst_20 {dimension_numbers = #tpu.dot_dimension_numbers<[1], [0], [0], [1], [0, 0, 1, 1], [], []>} : vector<19x16xf32>, vector<16x18xf32>, vector<19x18xf32> -> vector<19x18xf32>
    %c0_21 = arith.constant 0 : index
    %c1_22 = arith.constant 1 : index
    %c0_23 = arith.constant 0 : index
    %c0_24 = arith.constant 0 : index
    %15 = vector.load %arg7[%c0_21, %c1_22, %c0_23, %c0_24] : memref<1x8x19x18xf32, #tpu.memory_space<vmem>>, vector<1x1x19x18xf32>
    %16 = vector.shape_cast %15 : vector<1x1x19x18xf32> to vector<19x18xf32>
    %17 = vector.shape_cast %14 : vector<19x18xf32> to vector<1x1x19x18xf32>
    tpu.vector_store %arg7[%c0_21, %c1_22, %c0_23, %c0_24], %17 {strides = array<i32>} : memref<1x8x19x18xf32, #tpu.memory_space<vmem>>, vector<1x1x19x18xf32>,
    %c0_25 = arith.constant 0 : index
    %c0_26 = arith.constant 0 : index
    %18 = vector.load %arg3[%c0_25, %c0_26] : memref<19x16xf32, #tpu.memory_space<vmem>>, vector<19x16xf32>
    %c0_27 = arith.constant 0 : index
    %c2 = arith.constant 2 : index
    %c0_28 = arith.constant 0 : index
    %c0_29 = arith.constant 0 : index
    %19 = vector.load %arg1[%c0_27, %c2, %c0_28, %c0_29] : memref<1x4x16x16xf32, #tpu.memory_space<vmem>>, vector<1x1x16x16xf32>
    %20 = vector.shape_cast %19 : vector<1x1x16x16xf32> to vector<16x16xf32>
    %cst_30 = arith.constant dense<0.000000e+00> : vector<19x16xf32>
    %21 = tpu.matmul %18, %20, %cst_30 {dimension_numbers = #tpu.dot_dimension_numbers<[1], [0], [0], [1], [0, 0, 1, 1], [], []>} : vector<19x16xf32>, vector<16x16xf32>, vector<19x16xf32> -> vector<19x16xf32>
    %c0_31 = arith.constant 0 : index
    %c0_32 = arith.constant 0 : index
    %22 = vector.load %arg4[%c0_31, %c0_32] : memref<16x18xf32, #tpu.memory_space<vmem>>, vector<16x18xf32>
    %cst_33 = arith.constant dense<0.000000e+00> : vector<19x18xf32>
    %23 = tpu.matmul %21, %22, %cst_33 {dimension_numbers = #tpu.dot_dimension_numbers<[1], [0], [0], [1], [0, 0, 1, 1], [], []>} : vector<19x16xf32>, vector<16x18xf32>, vector<19x18xf32> -> vector<19x18xf32>
    %c0_34 = arith.constant 0 : index
    %c2_35 = arith.constant 2 : index
    %c0_36 = arith.constant 0 : index
    %c0_37 = arith.constant 0 : index
    %24 = vector.load %arg7[%c0_34, %c2_35, %c0_36, %c0_37] : memref<1x8x19x18xf32, #tpu.memory_space<vmem>>, vector<1x1x19x18xf32>
    %25 = vector.shape_cast %24 : vector<1x1x19x18xf32> to vector<19x18xf32>
    %26 = vector.shape_cast %23 : vector<19x18xf32> to vector<1x1x19x18xf32>
    tpu.vector_store %arg7[%c0_34, %c2_35, %c0_36, %c0_37], %26 {strides = array<i32>} : memref<1x8x19x18xf32, #tpu.memory_space<vmem>>, vector<1x1x19x18xf32>,
    %c0_38 = arith.constant 0 : index
    %c0_39 = arith.constant 0 : index
    %27 = vector.load %arg3[%c0_38, %c0_39] : memref<19x16xf32, #tpu.memory_space<vmem>>, vector<19x16xf32>
    %c0_40 = arith.constant 0 : index
    %c3 = arith.constant 3 : index
    %c0_41 = arith.constant 0 : index
    %c0_42 = arith.constant 0 : index
    %28 = vector.load %arg1[%c0_40, %c3, %c0_41, %c0_42] : memref<1x4x16x16xf32, #tpu.memory_space<vmem>>, vector<1x1x16x16xf32>
    %29 = vector.shape_cast %28 : vector<1x1x16x16xf32> to vector<16x16xf32>
    %cst_43 = arith.constant dense<0.000000e+00> : vector<19x16xf32>
    %30 = tpu.matmul %27, %29, %cst_43 {dimension_numbers = #tpu.dot_dimension_numbers<[1], [0], [0], [1], [0, 0, 1, 1], [], []>} : vector<19x16xf32>, vector<16x16xf32>, vector<19x16xf32> -> vector<19x16xf32>
    %c0_44 = arith.constant 0 : index
    %c0_45 = arith.constant 0 : index
    %31 = vector.load %arg4[%c0_44, %c0_45] : memref<16x18xf32, #tpu.memory_space<vmem>>, vector<16x18xf32>
    %cst_46 = arith.constant dense<0.000000e+00> : vector<19x18xf32>
    %32 = tpu.matmul %30, %31, %cst_46 {dimension_numbers = #tpu.dot_dimension_numbers<[1], [0], [0], [1], [0, 0, 1, 1], [], []>} : vector<19x16xf32>, vector<16x18xf32>, vector<19x18xf32> -> vector<19x18xf32>
    %c0_47 = arith.constant 0 : index
    %c3_48 = arith.constant 3 : index
    %c0_49 = arith.constant 0 : index
    %c0_50 = arith.constant 0 : index
    %33 = vector.load %arg7[%c0_47, %c3_48, %c0_49, %c0_50] : memref<1x8x19x18xf32, #tpu.memory_space<vmem>>, vector<1x1x19x18xf32>
    %34 = vector.shape_cast %33 : vector<1x1x19x18xf32> to vector<19x18xf32>
    %35 = vector.shape_cast %32 : vector<19x18xf32> to vector<1x1x19x18xf32>
    tpu.vector_store %arg7[%c0_47, %c3_48, %c0_49, %c0_50], %35 {strides = array<i32>} : memref<1x8x19x18xf32, #tpu.memory_space<vmem>>, vector<1x1x19x18xf32>,
    %c0_51 = arith.constant 0 : index
    %c0_52 = arith.constant 0 : index
    %36 = vector.load %arg5[%c0_51, %c0_52] : memref<19x8xf32, #tpu.memory_space<vmem>>, vector<19x8xf32>
    %c0_53 = arith.constant 0 : index
    %c0_54 = arith.constant 0 : index
    %c0_55 = arith.constant 0 : index
    %c0_56 = arith.constant 0 : index
    %37 = vector.load %arg2[%c0_53, %c0_54, %c0_55, %c0_56] : memref<1x4x8x8xf32, #tpu.memory_space<vmem>>, vector<1x1x8x8xf32>
    %38 = vector.shape_cast %37 : vector<1x1x8x8xf32> to vector<8x8xf32>
    %cst_57 = arith.constant dense<0.000000e+00> : vector<19x8xf32>
    %39 = tpu.matmul %36, %38, %cst_57 {dimension_numbers = #tpu.dot_dimension_numbers<[1], [0], [0], [1], [0, 0, 1, 1], [], []>} : vector<19x8xf32>, vector<8x8xf32>, vector<19x8xf32> -> vector<19x8xf32>
    %c0_58 = arith.constant 0 : index
    %c0_59 = arith.constant 0 : index
    %40 = vector.load %arg6[%c0_58, %c0_59] : memref<8x18xf32, #tpu.memory_space<vmem>>, vector<8x18xf32>
    %cst_60 = arith.constant dense<0.000000e+00> : vector<19x18xf32>
    %41 = tpu.matmul %39, %40, %cst_60 {dimension_numbers = #tpu.dot_dimension_numbers<[1], [0], [0], [1], [0, 0, 1, 1], [], []>} : vector<19x8xf32>, vector<8x18xf32>, vector<19x18xf32> -> vector<19x18xf32>
    %c0_61 = arith.constant 0 : index
    %c4 = arith.constant 4 : index
    %c0_62 = arith.constant 0 : index
    %c0_63 = arith.constant 0 : index
    %42 = vector.load %arg7[%c0_61, %c4, %c0_62, %c0_63] : memref<1x8x19x18xf32, #tpu.memory_space<vmem>>, vector<1x1x19x18xf32>
    %43 = vector.shape_cast %42 : vector<1x1x19x18xf32> to vector<19x18xf32>
    %44 = vector.shape_cast %41 : vector<19x18xf32> to vector<1x1x19x18xf32>
    tpu.vector_store %arg7[%c0_61, %c4, %c0_62, %c0_63], %44 {strides = array<i32>} : memref<1x8x19x18xf32, #tpu.memory_space<vmem>>, vector<1x1x19x18xf32>,
    %c0_64 = arith.constant 0 : index
    %c0_65 = arith.constant 0 : index
    %45 = vector.load %arg5[%c0_64, %c0_65] : memref<19x8xf32, #tpu.memory_space<vmem>>, vector<19x8xf32>
    %c0_66 = arith.constant 0 : index
    %c1_67 = arith.constant 1 : index
    %c0_68 = arith.constant 0 : index
    %c0_69 = arith.constant 0 : index
    %46 = vector.load %arg2[%c0_66, %c1_67, %c0_68, %c0_69] : memref<1x4x8x8xf32, #tpu.memory_space<vmem>>, vector<1x1x8x8xf32>
    %47 = vector.shape_cast %46 : vector<1x1x8x8xf32> to vector<8x8xf32>
    %cst_70 = arith.constant dense<0.000000e+00> : vector<19x8xf32>
    %48 = tpu.matmul %45, %47, %cst_70 {dimension_numbers = #tpu.dot_dimension_numbers<[1], [0], [0], [1], [0, 0, 1, 1], [], []>} : vector<19x8xf32>, vector<8x8xf32>, vector<19x8xf32> -> vector<19x8xf32>
    %c0_71 = arith.constant 0 : index
    %c0_72 = arith.constant 0 : index
    %49 = vector.load %arg6[%c0_71, %c0_72] : memref<8x18xf32, #tpu.memory_space<vmem>>, vector<8x18xf32>
    %cst_73 = arith.constant dense<0.000000e+00> : vector<19x18xf32>
    %50 = tpu.matmul %48, %49, %cst_73 {dimension_numbers = #tpu.dot_dimension_numbers<[1], [0], [0], [1], [0, 0, 1, 1], [], []>} : vector<19x8xf32>, vector<8x18xf32>, vector<19x18xf32> -> vector<19x18xf32>
    %c0_74 = arith.constant 0 : index
    %c5 = arith.constant 5 : index
    %c0_75 = arith.constant 0 : index
    %c0_76 = arith.constant 0 : index
    %51 = vector.load %arg7[%c0_74, %c5, %c0_75, %c0_76] : memref<1x8x19x18xf32, #tpu.memory_space<vmem>>, vector<1x1x19x18xf32>
    %52 = vector.shape_cast %51 : vector<1x1x19x18xf32> to vector<19x18xf32>
    %53 = vector.shape_cast %50 : vector<19x18xf32> to vector<1x1x19x18xf32>
    tpu.vector_store %arg7[%c0_74, %c5, %c0_75, %c0_76], %53 {strides = array<i32>} : memref<1x8x19x18xf32, #tpu.memory_space<vmem>>, vector<1x1x19x18xf32>,
    %c0_77 = arith.constant 0 : index
    %c0_78 = arith.constant 0 : index
    %54 = vector.load %arg5[%c0_77, %c0_78] : memref<19x8xf32, #tpu.memory_space<vmem>>, vector<19x8xf32>
    %c0_79 = arith.constant 0 : index
    %c2_80 = arith.constant 2 : index
    %c0_81 = arith.constant 0 : index
    %c0_82 = arith.constant 0 : index
    %55 = vector.load %arg2[%c0_79, %c2_80, %c0_81, %c0_82] : memref<1x4x8x8xf32, #tpu.memory_space<vmem>>, vector<1x1x8x8xf32>
    %56 = vector.shape_cast %55 : vector<1x1x8x8xf32> to vector<8x8xf32>
    %cst_83 = arith.constant dense<0.000000e+00> : vector<19x8xf32>
    %57 = tpu.matmul %54, %56, %cst_83 {dimension_numbers = #tpu.dot_dimension_numbers<[1], [0], [0], [1], [0, 0, 1, 1], [], []>} : vector<19x8xf32>, vector<8x8xf32>, vector<19x8xf32> -> vector<19x8xf32>
    %c0_84 = arith.constant 0 : index
    %c0_85 = arith.constant 0 : index
    %58 = vector.load %arg6[%c0_84, %c0_85] : memref<8x18xf32, #tpu.memory_space<vmem>>, vector<8x18xf32>
    %cst_86 = arith.constant dense<0.000000e+00> : vector<19x18xf32>
    %59 = tpu.matmul %57, %58, %cst_86 {dimension_numbers = #tpu.dot_dimension_numbers<[1], [0], [0], [1], [0, 0, 1, 1], [], []>} : vector<19x8xf32>, vector<8x18xf32>, vector<19x18xf32> -> vector<19x18xf32>
    %c0_87 = arith.constant 0 : index
    %c6 = arith.constant 6 : index
    %c0_88 = arith.constant 0 : index
    %c0_89 = arith.constant 0 : index
    %60 = vector.load %arg7[%c0_87, %c6, %c0_88, %c0_89] : memref<1x8x19x18xf32, #tpu.memory_space<vmem>>, vector<1x1x19x18xf32>
    %61 = vector.shape_cast %60 : vector<1x1x19x18xf32> to vector<19x18xf32>
    %62 = vector.shape_cast %59 : vector<19x18xf32> to vector<1x1x19x18xf32>
    tpu.vector_store %arg7[%c0_87, %c6, %c0_88, %c0_89], %62 {strides = array<i32>} : memref<1x8x19x18xf32, #tpu.memory_space<vmem>>, vector<1x1x19x18xf32>,
    %c0_90 = arith.constant 0 : index
    %c0_91 = arith.constant 0 : index
    %63 = vector.load %arg5[%c0_90, %c0_91] : memref<19x8xf32, #tpu.memory_space<vmem>>, vector<19x8xf32>
    %c0_92 = arith.constant 0 : index
    %c3_93 = arith.constant 3 : index
    %c0_94 = arith.constant 0 : index
    %c0_95 = arith.constant 0 : index
    %64 = vector.load %arg2[%c0_92, %c3_93, %c0_94, %c0_95] : memref<1x4x8x8xf32, #tpu.memory_space<vmem>>, vector<1x1x8x8xf32>
    %65 = vector.shape_cast %64 : vector<1x1x8x8xf32> to vector<8x8xf32>
    %cst_96 = arith.constant dense<0.000000e+00> : vector<19x8xf32>
    %66 = tpu.matmul %63, %65, %cst_96 {dimension_numbers = #tpu.dot_dimension_numbers<[1], [0], [0], [1], [0, 0, 1, 1], [], []>} : vector<19x8xf32>, vector<8x8xf32>, vector<19x8xf32> -> vector<19x8xf32>
    %c0_97 = arith.constant 0 : index
    %c0_98 = arith.constant 0 : index
    %67 = vector.load %arg6[%c0_97, %c0_98] : memref<8x18xf32, #tpu.memory_space<vmem>>, vector<8x18xf32>
    %cst_99 = arith.constant dense<0.000000e+00> : vector<19x18xf32>
    %68 = tpu.matmul %66, %67, %cst_99 {dimension_numbers = #tpu.dot_dimension_numbers<[1], [0], [0], [1], [0, 0, 1, 1], [], []>} : vector<19x8xf32>, vector<8x18xf32>, vector<19x18xf32> -> vector<19x18xf32>
    %c0_100 = arith.constant 0 : index
    %c7 = arith.constant 7 : index
    %c0_101 = arith.constant 0 : index
    %c0_102 = arith.constant 0 : index
    %69 = vector.load %arg7[%c0_100, %c7, %c0_101, %c0_102] : memref<1x8x19x18xf32, #tpu.memory_space<vmem>>, vector<1x1x19x18xf32>
    %70 = vector.shape_cast %69 : vector<1x1x19x18xf32> to vector<19x18xf32>
    %71 = vector.shape_cast %68 : vector<19x18xf32> to vector<1x1x19x18xf32>
    tpu.vector_store %arg7[%c0_100, %c7, %c0_101, %c0_102], %71 {strides = array<i32>} : memref<1x8x19x18xf32, #tpu.memory_space<vmem>>, vector<1x1x19x18xf32>,
    return
  }
  func.func @transform_0(%arg0: i32) -> (i32, i32, i32, i32) {
    %c0_i32 = arith.constant 0 : i32
    %c0_i32_0 = arith.constant 0 : i32
    %c0_i32_1 = arith.constant 0 : i32
    %c0_i32_2 = arith.constant 0 : i32
    return %arg0, %c0_i32, %c0_i32_0, %c0_i32_1 : i32, i32, i32, i32
  }
  func.func @transform_1(%arg0: i32) -> (i32, i32, i32, i32) {
    %c0_i32 = arith.constant 0 : i32
    %c0_i32_0 = arith.constant 0 : i32
    %c0_i32_1 = arith.constant 0 : i32
    %c0_i32_2 = arith.constant 0 : i32
    return %arg0, %c0_i32, %c0_i32_0, %c0_i32_1 : i32, i32, i32, i32
  }
  func.func @transform_2(%arg0: i32) -> (i32, i32) {
    %c0_i32 = arith.constant 0 : i32
    %c0_i32_0 = arith.constant 0 : i32
    %c0_i32_1 = arith.constant 0 : i32
    return %c0_i32, %c0_i32_0 : i32, i32
  }
  func.func @transform_3(%arg0: i32) -> (i32, i32) {
    %c0_i32 = arith.constant 0 : i32
    %c0_i32_0 = arith.constant 0 : i32
    %c0_i32_1 = arith.constant 0 : i32
    return %c0_i32, %c0_i32_0 : i32, i32
  }
  func.func @transform_4(%arg0: i32) -> (i32, i32) {
    %c0_i32 = arith.constant 0 : i32
    %c0_i32_0 = arith.constant 0 : i32
    %c0_i32_1 = arith.constant 0 : i32
    return %c0_i32, %c0_i32_0 : i32, i32
  }
  func.func @transform_5(%arg0: i32) -> (i32, i32) {
    %c0_i32 = arith.constant 0 : i32
    %c0_i32_0 = arith.constant 0 : i32
    %c0_i32_1 = arith.constant 0 : i32
    return %c0_i32, %c0_i32_0 : i32, i32
  }
  func.func @transform_6(%arg0: i32) -> (i32, i32, i32, i32) {
    %c0_i32 = arith.constant 0 : i32
    %c0_i32_0 = arith.constant 0 : i32
    %c0_i32_1 = arith.constant 0 : i32
    %c0_i32_2 = arith.constant 0 : i32
    return %arg0, %c0_i32, %c0_i32_0, %c0_i32_1 : i32, i32, i32, i32
  }
}

module attributes {stable_mosaic.version = 11 : i64} {
  func.func @_double_conv_kernel(%arg0: i32, %arg1: memref<1x8x342xf32, #tpu.memory_space<vmem>>, %arg2: memref<9x4x8xf32, #tpu.memory_space<vmem>>, %arg3: memref<4x1xf32, #tpu.memory_space<vmem>>, %arg4: memref<4x1xf32, #tpu.memory_space<vmem>>, %arg5: memref<9x4x4xf32, #tpu.memory_space<vmem>>, %arg6: memref<4x1xf32, #tpu.memory_space<vmem>>, %arg7: memref<4x1xf32, #tpu.memory_space<vmem>>, %arg8: memref<1x288xf32, #tpu.memory_space<vmem>>, %arg9: memref<1x4x288xf32, #tpu.memory_space<vmem>>, %arg10: memref<4x342xf32, #tpu.memory_space<vmem>>) attributes {dimension_semantics = [#tpu.dimension_semantics<parallel>], iteration_bounds = array<i64: 2>, scalar_prefetch = 0 : i64, scratch_operands = 1 : i64, tpu.core_type = #tpu.core_type<tc>, window_params = [{transform_indices = @transform_0, window_bounds = array<i64: 1, 8, 342>}, {pipeline_mode = #tpu.pipeline_mode<synchronous>, transform_indices = @transform_1, window_bounds = array<i64: 9, 4, 8>}, {pipeline_mode = #tpu.pipeline_mode<synchronous>, transform_indices = @transform_2, window_bounds = array<i64: 4, 1>}, {pipeline_mode = #tpu.pipeline_mode<synchronous>, transform_indices = @transform_3, window_bounds = array<i64: 4, 1>}, {pipeline_mode = #tpu.pipeline_mode<synchronous>, transform_indices = @transform_4, window_bounds = array<i64: 9, 4, 4>}, {pipeline_mode = #tpu.pipeline_mode<synchronous>, transform_indices = @transform_5, window_bounds = array<i64: 4, 1>}, {pipeline_mode = #tpu.pipeline_mode<synchronous>, transform_indices = @transform_6, window_bounds = array<i64: 4, 1>}, {pipeline_mode = #tpu.pipeline_mode<synchronous>, transform_indices = @transform_7, window_bounds = array<i64: 1, 288>}, {transform_indices = @transform_8, window_bounds = array<i64: 1, 4, 288>}]} {
    %cst = arith.constant 0.000000e+00 : f32
    %0 = vector.broadcast %cst : f32 to vector<4x288xf32>
    %c0 = arith.constant 0 : index
    %c0_0 = arith.constant 0 : index
    %c0_1 = arith.constant 0 : index
    %1 = vector.load %arg2[%c0, %c0_0, %c0_1] : memref<9x4x8xf32, #tpu.memory_space<vmem>>, vector<1x4x8xf32>
    %2 = vector.shape_cast %1 : vector<1x4x8xf32> to vector<4x8xf32>
    %c0_2 = arith.constant 0 : index
    %c0_3 = arith.constant 0 : index
    %c0_4 = arith.constant 0 : index
    %3 = vector.load %arg1[%c0_2, %c0_3, %c0_4] : memref<1x8x342xf32, #tpu.memory_space<vmem>>, vector<1x8x288xf32>
    %4 = vector.shape_cast %3 : vector<1x8x288xf32> to vector<8x288xf32>
    %cst_5 = arith.constant dense<0.000000e+00> : vector<4x288xf32>
    %5 = tpu.matmul %2, %4, %cst_5 {dimension_numbers = #tpu.dot_dimension_numbers<[1], [0], [0], [1], [0, 0, 1, 1], [], []>} : vector<4x8xf32>, vector<8x288xf32>, vector<4x288xf32> -> vector<4x288xf32>
    %6 = arith.addf %0, %5 : vector<4x288xf32>
    %c1 = arith.constant 1 : index
    %c0_6 = arith.constant 0 : index
    %c0_7 = arith.constant 0 : index
    %7 = vector.load %arg2[%c1, %c0_6, %c0_7] : memref<9x4x8xf32, #tpu.memory_space<vmem>>, vector<1x4x8xf32>
    %8 = vector.shape_cast %7 : vector<1x4x8xf32> to vector<4x8xf32>
    %c0_8 = arith.constant 0 : index
    %c0_9 = arith.constant 0 : index
    %c1_10 = arith.constant 1 : index
    %9 = vector.load %arg1[%c0_8, %c0_9, %c1_10] : memref<1x8x342xf32, #tpu.memory_space<vmem>>, vector<1x8x288xf32>
    %10 = vector.shape_cast %9 : vector<1x8x288xf32> to vector<8x288xf32>
    %cst_11 = arith.constant dense<0.000000e+00> : vector<4x288xf32>
    %11 = tpu.matmul %8, %10, %cst_11 {dimension_numbers = #tpu.dot_dimension_numbers<[1], [0], [0], [1], [0, 0, 1, 1], [], []>} : vector<4x8xf32>, vector<8x288xf32>, vector<4x288xf32> -> vector<4x288xf32>
    %12 = arith.addf %6, %11 : vector<4x288xf32>
    %c2 = arith.constant 2 : index
    %c0_12 = arith.constant 0 : index
    %c0_13 = arith.constant 0 : index
    %13 = vector.load %arg2[%c2, %c0_12, %c0_13] : memref<9x4x8xf32, #tpu.memory_space<vmem>>, vector<1x4x8xf32>
    %14 = vector.shape_cast %13 : vector<1x4x8xf32> to vector<4x8xf32>
    %c0_14 = arith.constant 0 : index
    %c0_15 = arith.constant 0 : index
    %c2_16 = arith.constant 2 : index
    %15 = vector.load %arg1[%c0_14, %c0_15, %c2_16] : memref<1x8x342xf32, #tpu.memory_space<vmem>>, vector<1x8x288xf32>
    %16 = vector.shape_cast %15 : vector<1x8x288xf32> to vector<8x288xf32>
    %cst_17 = arith.constant dense<0.000000e+00> : vector<4x288xf32>
    %17 = tpu.matmul %14, %16, %cst_17 {dimension_numbers = #tpu.dot_dimension_numbers<[1], [0], [0], [1], [0, 0, 1, 1], [], []>} : vector<4x8xf32>, vector<8x288xf32>, vector<4x288xf32> -> vector<4x288xf32>
    %18 = arith.addf %12, %17 : vector<4x288xf32>
    %c3 = arith.constant 3 : index
    %c0_18 = arith.constant 0 : index
    %c0_19 = arith.constant 0 : index
    %19 = vector.load %arg2[%c3, %c0_18, %c0_19] : memref<9x4x8xf32, #tpu.memory_space<vmem>>, vector<1x4x8xf32>
    %20 = vector.shape_cast %19 : vector<1x4x8xf32> to vector<4x8xf32>
    %c0_20 = arith.constant 0 : index
    %c0_21 = arith.constant 0 : index
    %c18 = arith.constant 18 : index
    %21 = vector.load %arg1[%c0_20, %c0_21, %c18] : memref<1x8x342xf32, #tpu.memory_space<vmem>>, vector<1x8x288xf32>
    %22 = vector.shape_cast %21 : vector<1x8x288xf32> to vector<8x288xf32>
    %cst_22 = arith.constant dense<0.000000e+00> : vector<4x288xf32>
    %23 = tpu.matmul %20, %22, %cst_22 {dimension_numbers = #tpu.dot_dimension_numbers<[1], [0], [0], [1], [0, 0, 1, 1], [], []>} : vector<4x8xf32>, vector<8x288xf32>, vector<4x288xf32> -> vector<4x288xf32>
    %24 = arith.addf %18, %23 : vector<4x288xf32>
    %c4 = arith.constant 4 : index
    %c0_23 = arith.constant 0 : index
    %c0_24 = arith.constant 0 : index
    %25 = vector.load %arg2[%c4, %c0_23, %c0_24] : memref<9x4x8xf32, #tpu.memory_space<vmem>>, vector<1x4x8xf32>
    %26 = vector.shape_cast %25 : vector<1x4x8xf32> to vector<4x8xf32>
    %c0_25 = arith.constant 0 : index
    %c0_26 = arith.constant 0 : index
    %c19 = arith.constant 19 : index
    %27 = vector.load %arg1[%c0_25, %c0_26, %c19] : memref<1x8x342xf32, #tpu.memory_space<vmem>>, vector<1x8x288xf32>
    %28 = vector.shape_cast %27 : vector<1x8x288xf32> to vector<8x288xf32>
    %cst_27 = arith.constant dense<0.000000e+00> : vector<4x288xf32>
    %29 = tpu.matmul %26, %28, %cst_27 {dimension_numbers = #tpu.dot_dimension_numbers<[1], [0], [0], [1], [0, 0, 1, 1], [], []>} : vector<4x8xf32>, vector<8x288xf32>, vector<4x288xf32> -> vector<4x288xf32>
    %30 = arith.addf %24, %29 : vector<4x288xf32>
    %c5 = arith.constant 5 : index
    %c0_28 = arith.constant 0 : index
    %c0_29 = arith.constant 0 : index
    %31 = vector.load %arg2[%c5, %c0_28, %c0_29] : memref<9x4x8xf32, #tpu.memory_space<vmem>>, vector<1x4x8xf32>
    %32 = vector.shape_cast %31 : vector<1x4x8xf32> to vector<4x8xf32>
    %c0_30 = arith.constant 0 : index
    %c0_31 = arith.constant 0 : index
    %c20 = arith.constant 20 : index
    %33 = vector.load %arg1[%c0_30, %c0_31, %c20] : memref<1x8x342xf32, #tpu.memory_space<vmem>>, vector<1x8x288xf32>
    %34 = vector.shape_cast %33 : vector<1x8x288xf32> to vector<8x288xf32>
    %cst_32 = arith.constant dense<0.000000e+00> : vector<4x288xf32>
    %35 = tpu.matmul %32, %34, %cst_32 {dimension_numbers = #tpu.dot_dimension_numbers<[1], [0], [0], [1], [0, 0, 1, 1], [], []>} : vector<4x8xf32>, vector<8x288xf32>, vector<4x288xf32> -> vector<4x288xf32>
    %36 = arith.addf %30, %35 : vector<4x288xf32>
    %c6 = arith.constant 6 : index
    %c0_33 = arith.constant 0 : index
    %c0_34 = arith.constant 0 : index
    %37 = vector.load %arg2[%c6, %c0_33, %c0_34] : memref<9x4x8xf32, #tpu.memory_space<vmem>>, vector<1x4x8xf32>
    %38 = vector.shape_cast %37 : vector<1x4x8xf32> to vector<4x8xf32>
    %c0_35 = arith.constant 0 : index
    %c0_36 = arith.constant 0 : index
    %c36 = arith.constant 36 : index
    %39 = vector.load %arg1[%c0_35, %c0_36, %c36] : memref<1x8x342xf32, #tpu.memory_space<vmem>>, vector<1x8x288xf32>
    %40 = vector.shape_cast %39 : vector<1x8x288xf32> to vector<8x288xf32>
    %cst_37 = arith.constant dense<0.000000e+00> : vector<4x288xf32>
    %41 = tpu.matmul %38, %40, %cst_37 {dimension_numbers = #tpu.dot_dimension_numbers<[1], [0], [0], [1], [0, 0, 1, 1], [], []>} : vector<4x8xf32>, vector<8x288xf32>, vector<4x288xf32> -> vector<4x288xf32>
    %42 = arith.addf %36, %41 : vector<4x288xf32>
    %c7 = arith.constant 7 : index
    %c0_38 = arith.constant 0 : index
    %c0_39 = arith.constant 0 : index
    %43 = vector.load %arg2[%c7, %c0_38, %c0_39] : memref<9x4x8xf32, #tpu.memory_space<vmem>>, vector<1x4x8xf32>
    %44 = vector.shape_cast %43 : vector<1x4x8xf32> to vector<4x8xf32>
    %c0_40 = arith.constant 0 : index
    %c0_41 = arith.constant 0 : index
    %c37 = arith.constant 37 : index
    %45 = vector.load %arg1[%c0_40, %c0_41, %c37] : memref<1x8x342xf32, #tpu.memory_space<vmem>>, vector<1x8x288xf32>
    %46 = vector.shape_cast %45 : vector<1x8x288xf32> to vector<8x288xf32>
    %cst_42 = arith.constant dense<0.000000e+00> : vector<4x288xf32>
    %47 = tpu.matmul %44, %46, %cst_42 {dimension_numbers = #tpu.dot_dimension_numbers<[1], [0], [0], [1], [0, 0, 1, 1], [], []>} : vector<4x8xf32>, vector<8x288xf32>, vector<4x288xf32> -> vector<4x288xf32>
    %48 = arith.addf %42, %47 : vector<4x288xf32>
    %c8 = arith.constant 8 : index
    %c0_43 = arith.constant 0 : index
    %c0_44 = arith.constant 0 : index
    %49 = vector.load %arg2[%c8, %c0_43, %c0_44] : memref<9x4x8xf32, #tpu.memory_space<vmem>>, vector<1x4x8xf32>
    %50 = vector.shape_cast %49 : vector<1x4x8xf32> to vector<4x8xf32>
    %c0_45 = arith.constant 0 : index
    %c0_46 = arith.constant 0 : index
    %c38 = arith.constant 38 : index
    %51 = vector.load %arg1[%c0_45, %c0_46, %c38] : memref<1x8x342xf32, #tpu.memory_space<vmem>>, vector<1x8x288xf32>
    %52 = vector.shape_cast %51 : vector<1x8x288xf32> to vector<8x288xf32>
    %cst_47 = arith.constant dense<0.000000e+00> : vector<4x288xf32>
    %53 = tpu.matmul %50, %52, %cst_47 {dimension_numbers = #tpu.dot_dimension_numbers<[1], [0], [0], [1], [0, 0, 1, 1], [], []>} : vector<4x8xf32>, vector<8x288xf32>, vector<4x288xf32> -> vector<4x288xf32>
    %54 = arith.addf %48, %53 : vector<4x288xf32>
    %c0_48 = arith.constant 0 : index
    %c0_49 = arith.constant 0 : index
    %55 = vector.load %arg3[%c0_48, %c0_49] : memref<4x1xf32, #tpu.memory_space<vmem>>, vector<4x1xf32>
    %56 = vector.broadcast %55 : vector<4x1xf32> to vector<4x288xf32>
    %57 = arith.mulf %54, %56 : vector<4x288xf32>
    %c0_50 = arith.constant 0 : index
    %c0_51 = arith.constant 0 : index
    %58 = vector.load %arg4[%c0_50, %c0_51] : memref<4x1xf32, #tpu.memory_space<vmem>>, vector<4x1xf32>
    %59 = vector.broadcast %58 : vector<4x1xf32> to vector<4x288xf32>
    %60 = arith.addf %57, %59 : vector<4x288xf32>
    %cst_52 = arith.constant 0.000000e+00 : f32
    %61 = vector.broadcast %cst_52 : f32 to vector<4x288xf32>
    %62 = arith.maximumf %60, %61 : vector<4x288xf32>
    %c0_53 = arith.constant 0 : index
    %c0_54 = arith.constant 0 : index
    %63 = vector.load %arg8[%c0_53, %c0_54] : memref<1x288xf32, #tpu.memory_space<vmem>>, vector<1x288xf32>
    %64 = vector.broadcast %63 : vector<1x288xf32> to vector<4x288xf32>
    %65 = arith.mulf %62, %64 : vector<4x288xf32>
    %cst_55 = arith.constant 0.000000e+00 : f32
    %66 = vector.broadcast %cst_55 : f32 to vector<4x342xf32>
    %c0_56 = arith.constant 0 : index
    %c0_57 = arith.constant 0 : index
    %67 = vector.load %arg10[%c0_56, %c0_57] : memref<4x342xf32, #tpu.memory_space<vmem>>, vector<4x342xf32>
    tpu.vector_store %arg10[%c0_56, %c0_57], %66 {strides = array<i32>} : memref<4x342xf32, #tpu.memory_space<vmem>>, vector<4x342xf32>,
    %c0_58 = arith.constant 0 : index
    %c19_59 = arith.constant 19 : index
    %68 = vector.load %arg10[%c0_58, %c19_59] : memref<4x342xf32, #tpu.memory_space<vmem>>, vector<4x288xf32>
    tpu.vector_store %arg10[%c0_58, %c19_59], %65 {strides = array<i32>} : memref<4x342xf32, #tpu.memory_space<vmem>>, vector<4x288xf32>,
    %cst_60 = arith.constant 0.000000e+00 : f32
    %69 = vector.broadcast %cst_60 : f32 to vector<4x288xf32>
    %c0_61 = arith.constant 0 : index
    %c0_62 = arith.constant 0 : index
    %c0_63 = arith.constant 0 : index
    %70 = vector.load %arg5[%c0_61, %c0_62, %c0_63] : memref<9x4x4xf32, #tpu.memory_space<vmem>>, vector<1x4x4xf32>
    %71 = vector.shape_cast %70 : vector<1x4x4xf32> to vector<4x4xf32>
    %c0_64 = arith.constant 0 : index
    %c0_65 = arith.constant 0 : index
    %72 = vector.load %arg10[%c0_64, %c0_65] : memref<4x342xf32, #tpu.memory_space<vmem>>, vector<4x288xf32>
    %cst_66 = arith.constant dense<0.000000e+00> : vector<4x288xf32>
    %73 = tpu.matmul %71, %72, %cst_66 {dimension_numbers = #tpu.dot_dimension_numbers<[1], [0], [0], [1], [0, 0, 1, 1], [], []>} : vector<4x4xf32>, vector<4x288xf32>, vector<4x288xf32> -> vector<4x288xf32>
    %74 = arith.addf %69, %73 : vector<4x288xf32>
    %c1_67 = arith.constant 1 : index
    %c0_68 = arith.constant 0 : index
    %c0_69 = arith.constant 0 : index
    %75 = vector.load %arg5[%c1_67, %c0_68, %c0_69] : memref<9x4x4xf32, #tpu.memory_space<vmem>>, vector<1x4x4xf32>
    %76 = vector.shape_cast %75 : vector<1x4x4xf32> to vector<4x4xf32>
    %c0_70 = arith.constant 0 : index
    %c1_71 = arith.constant 1 : index
    %77 = vector.load %arg10[%c0_70, %c1_71] : memref<4x342xf32, #tpu.memory_space<vmem>>, vector<4x288xf32>
    %cst_72 = arith.constant dense<0.000000e+00> : vector<4x288xf32>
    %78 = tpu.matmul %76, %77, %cst_72 {dimension_numbers = #tpu.dot_dimension_numbers<[1], [0], [0], [1], [0, 0, 1, 1], [], []>} : vector<4x4xf32>, vector<4x288xf32>, vector<4x288xf32> -> vector<4x288xf32>
    %79 = arith.addf %74, %78 : vector<4x288xf32>
    %c2_73 = arith.constant 2 : index
    %c0_74 = arith.constant 0 : index
    %c0_75 = arith.constant 0 : index
    %80 = vector.load %arg5[%c2_73, %c0_74, %c0_75] : memref<9x4x4xf32, #tpu.memory_space<vmem>>, vector<1x4x4xf32>
    %81 = vector.shape_cast %80 : vector<1x4x4xf32> to vector<4x4xf32>
    %c0_76 = arith.constant 0 : index
    %c2_77 = arith.constant 2 : index
    %82 = vector.load %arg10[%c0_76, %c2_77] : memref<4x342xf32, #tpu.memory_space<vmem>>, vector<4x288xf32>
    %cst_78 = arith.constant dense<0.000000e+00> : vector<4x288xf32>
    %83 = tpu.matmul %81, %82, %cst_78 {dimension_numbers = #tpu.dot_dimension_numbers<[1], [0], [0], [1], [0, 0, 1, 1], [], []>} : vector<4x4xf32>, vector<4x288xf32>, vector<4x288xf32> -> vector<4x288xf32>
    %84 = arith.addf %79, %83 : vector<4x288xf32>
    %c3_79 = arith.constant 3 : index
    %c0_80 = arith.constant 0 : index
    %c0_81 = arith.constant 0 : index
    %85 = vector.load %arg5[%c3_79, %c0_80, %c0_81] : memref<9x4x4xf32, #tpu.memory_space<vmem>>, vector<1x4x4xf32>
    %86 = vector.shape_cast %85 : vector<1x4x4xf32> to vector<4x4xf32>
    %c0_82 = arith.constant 0 : index
    %c18_83 = arith.constant 18 : index
    %87 = vector.load %arg10[%c0_82, %c18_83] : memref<4x342xf32, #tpu.memory_space<vmem>>, vector<4x288xf32>
    %cst_84 = arith.constant dense<0.000000e+00> : vector<4x288xf32>
    %88 = tpu.matmul %86, %87, %cst_84 {dimension_numbers = #tpu.dot_dimension_numbers<[1], [0], [0], [1], [0, 0, 1, 1], [], []>} : vector<4x4xf32>, vector<4x288xf32>, vector<4x288xf32> -> vector<4x288xf32>
    %89 = arith.addf %84, %88 : vector<4x288xf32>
    %c4_85 = arith.constant 4 : index
    %c0_86 = arith.constant 0 : index
    %c0_87 = arith.constant 0 : index
    %90 = vector.load %arg5[%c4_85, %c0_86, %c0_87] : memref<9x4x4xf32, #tpu.memory_space<vmem>>, vector<1x4x4xf32>
    %91 = vector.shape_cast %90 : vector<1x4x4xf32> to vector<4x4xf32>
    %c0_88 = arith.constant 0 : index
    %c19_89 = arith.constant 19 : index
    %92 = vector.load %arg10[%c0_88, %c19_89] : memref<4x342xf32, #tpu.memory_space<vmem>>, vector<4x288xf32>
    %cst_90 = arith.constant dense<0.000000e+00> : vector<4x288xf32>
    %93 = tpu.matmul %91, %92, %cst_90 {dimension_numbers = #tpu.dot_dimension_numbers<[1], [0], [0], [1], [0, 0, 1, 1], [], []>} : vector<4x4xf32>, vector<4x288xf32>, vector<4x288xf32> -> vector<4x288xf32>
    %94 = arith.addf %89, %93 : vector<4x288xf32>
    %c5_91 = arith.constant 5 : index
    %c0_92 = arith.constant 0 : index
    %c0_93 = arith.constant 0 : index
    %95 = vector.load %arg5[%c5_91, %c0_92, %c0_93] : memref<9x4x4xf32, #tpu.memory_space<vmem>>, vector<1x4x4xf32>
    %96 = vector.shape_cast %95 : vector<1x4x4xf32> to vector<4x4xf32>
    %c0_94 = arith.constant 0 : index
    %c20_95 = arith.constant 20 : index
    %97 = vector.load %arg10[%c0_94, %c20_95] : memref<4x342xf32, #tpu.memory_space<vmem>>, vector<4x288xf32>
    %cst_96 = arith.constant dense<0.000000e+00> : vector<4x288xf32>
    %98 = tpu.matmul %96, %97, %cst_96 {dimension_numbers = #tpu.dot_dimension_numbers<[1], [0], [0], [1], [0, 0, 1, 1], [], []>} : vector<4x4xf32>, vector<4x288xf32>, vector<4x288xf32> -> vector<4x288xf32>
    %99 = arith.addf %94, %98 : vector<4x288xf32>
    %c6_97 = arith.constant 6 : index
    %c0_98 = arith.constant 0 : index
    %c0_99 = arith.constant 0 : index
    %100 = vector.load %arg5[%c6_97, %c0_98, %c0_99] : memref<9x4x4xf32, #tpu.memory_space<vmem>>, vector<1x4x4xf32>
    %101 = vector.shape_cast %100 : vector<1x4x4xf32> to vector<4x4xf32>
    %c0_100 = arith.constant 0 : index
    %c36_101 = arith.constant 36 : index
    %102 = vector.load %arg10[%c0_100, %c36_101] : memref<4x342xf32, #tpu.memory_space<vmem>>, vector<4x288xf32>
    %cst_102 = arith.constant dense<0.000000e+00> : vector<4x288xf32>
    %103 = tpu.matmul %101, %102, %cst_102 {dimension_numbers = #tpu.dot_dimension_numbers<[1], [0], [0], [1], [0, 0, 1, 1], [], []>} : vector<4x4xf32>, vector<4x288xf32>, vector<4x288xf32> -> vector<4x288xf32>
    %104 = arith.addf %99, %103 : vector<4x288xf32>
    %c7_103 = arith.constant 7 : index
    %c0_104 = arith.constant 0 : index
    %c0_105 = arith.constant 0 : index
    %105 = vector.load %arg5[%c7_103, %c0_104, %c0_105] : memref<9x4x4xf32, #tpu.memory_space<vmem>>, vector<1x4x4xf32>
    %106 = vector.shape_cast %105 : vector<1x4x4xf32> to vector<4x4xf32>
    %c0_106 = arith.constant 0 : index
    %c37_107 = arith.constant 37 : index
    %107 = vector.load %arg10[%c0_106, %c37_107] : memref<4x342xf32, #tpu.memory_space<vmem>>, vector<4x288xf32>
    %cst_108 = arith.constant dense<0.000000e+00> : vector<4x288xf32>
    %108 = tpu.matmul %106, %107, %cst_108 {dimension_numbers = #tpu.dot_dimension_numbers<[1], [0], [0], [1], [0, 0, 1, 1], [], []>} : vector<4x4xf32>, vector<4x288xf32>, vector<4x288xf32> -> vector<4x288xf32>
    %109 = arith.addf %104, %108 : vector<4x288xf32>
    %c8_109 = arith.constant 8 : index
    %c0_110 = arith.constant 0 : index
    %c0_111 = arith.constant 0 : index
    %110 = vector.load %arg5[%c8_109, %c0_110, %c0_111] : memref<9x4x4xf32, #tpu.memory_space<vmem>>, vector<1x4x4xf32>
    %111 = vector.shape_cast %110 : vector<1x4x4xf32> to vector<4x4xf32>
    %c0_112 = arith.constant 0 : index
    %c38_113 = arith.constant 38 : index
    %112 = vector.load %arg10[%c0_112, %c38_113] : memref<4x342xf32, #tpu.memory_space<vmem>>, vector<4x288xf32>
    %cst_114 = arith.constant dense<0.000000e+00> : vector<4x288xf32>
    %113 = tpu.matmul %111, %112, %cst_114 {dimension_numbers = #tpu.dot_dimension_numbers<[1], [0], [0], [1], [0, 0, 1, 1], [], []>} : vector<4x4xf32>, vector<4x288xf32>, vector<4x288xf32> -> vector<4x288xf32>
    %114 = arith.addf %109, %113 : vector<4x288xf32>
    %c0_115 = arith.constant 0 : index
    %c0_116 = arith.constant 0 : index
    %115 = vector.load %arg6[%c0_115, %c0_116] : memref<4x1xf32, #tpu.memory_space<vmem>>, vector<4x1xf32>
    %116 = vector.broadcast %115 : vector<4x1xf32> to vector<4x288xf32>
    %117 = arith.mulf %114, %116 : vector<4x288xf32>
    %c0_117 = arith.constant 0 : index
    %c0_118 = arith.constant 0 : index
    %118 = vector.load %arg7[%c0_117, %c0_118] : memref<4x1xf32, #tpu.memory_space<vmem>>, vector<4x1xf32>
    %119 = vector.broadcast %118 : vector<4x1xf32> to vector<4x288xf32>
    %120 = arith.addf %117, %119 : vector<4x288xf32>
    %cst_119 = arith.constant 0.000000e+00 : f32
    %121 = vector.broadcast %cst_119 : f32 to vector<4x288xf32>
    %122 = arith.maximumf %120, %121 : vector<4x288xf32>
    %c0_120 = arith.constant 0 : index
    %c0_121 = arith.constant 0 : index
    %c0_122 = arith.constant 0 : index
    %123 = vector.load %arg9[%c0_120, %c0_121, %c0_122] : memref<1x4x288xf32, #tpu.memory_space<vmem>>, vector<1x4x288xf32>
    %124 = vector.shape_cast %123 : vector<1x4x288xf32> to vector<4x288xf32>
    %125 = vector.shape_cast %122 : vector<4x288xf32> to vector<1x4x288xf32>
    tpu.vector_store %arg9[%c0_120, %c0_121, %c0_122], %125 {strides = array<i32>} : memref<1x4x288xf32, #tpu.memory_space<vmem>>, vector<1x4x288xf32>,
    return
  }
  func.func @transform_0(%arg0: i32) -> (i32, i32, i32) {
    %c0_i32 = arith.constant 0 : i32
    %c0_i32_0 = arith.constant 0 : i32
    %c0_i32_1 = arith.constant 0 : i32
    return %arg0, %c0_i32, %c0_i32_0 : i32, i32, i32
  }
  func.func @transform_1(%arg0: i32) -> (i32, i32, i32) {
    %c0_i32 = arith.constant 0 : i32
    %c0_i32_0 = arith.constant 0 : i32
    %c0_i32_1 = arith.constant 0 : i32
    %c0_i32_2 = arith.constant 0 : i32
    return %c0_i32, %c0_i32_0, %c0_i32_1 : i32, i32, i32
  }
  func.func @transform_2(%arg0: i32) -> (i32, i32) {
    %c0_i32 = arith.constant 0 : i32
    %c0_i32_0 = arith.constant 0 : i32
    %c0_i32_1 = arith.constant 0 : i32
    return %c0_i32, %c0_i32_0 : i32, i32
  }
  func.func @transform_3(%arg0: i32) -> (i32, i32) {
    %c0_i32 = arith.constant 0 : i32
    %c0_i32_0 = arith.constant 0 : i32
    %c0_i32_1 = arith.constant 0 : i32
    return %c0_i32, %c0_i32_0 : i32, i32
  }
  func.func @transform_4(%arg0: i32) -> (i32, i32, i32) {
    %c0_i32 = arith.constant 0 : i32
    %c0_i32_0 = arith.constant 0 : i32
    %c0_i32_1 = arith.constant 0 : i32
    %c0_i32_2 = arith.constant 0 : i32
    return %c0_i32, %c0_i32_0, %c0_i32_1 : i32, i32, i32
  }
  func.func @transform_5(%arg0: i32) -> (i32, i32) {
    %c0_i32 = arith.constant 0 : i32
    %c0_i32_0 = arith.constant 0 : i32
    %c0_i32_1 = arith.constant 0 : i32
    return %c0_i32, %c0_i32_0 : i32, i32
  }
  func.func @transform_6(%arg0: i32) -> (i32, i32) {
    %c0_i32 = arith.constant 0 : i32
    %c0_i32_0 = arith.constant 0 : i32
    %c0_i32_1 = arith.constant 0 : i32
    return %c0_i32, %c0_i32_0 : i32, i32
  }
  func.func @transform_7(%arg0: i32) -> (i32, i32) {
    %c0_i32 = arith.constant 0 : i32
    %c0_i32_0 = arith.constant 0 : i32
    %c0_i32_1 = arith.constant 0 : i32
    return %c0_i32, %c0_i32_0 : i32, i32
  }
  func.func @transform_8(%arg0: i32) -> (i32, i32, i32) {
    %c0_i32 = arith.constant 0 : i32
    %c0_i32_0 = arith.constant 0 : i32
    %c0_i32_1 = arith.constant 0 : i32
    return %arg0, %c0_i32, %c0_i32_0 : i32, i32, i32
  }
}

</mosaic_0001>

<bundles_post_ra>
// kernel: up_forward.2
= control target key start
LH: loop header
LB: loop body
LE: loop exit
PB: predicated region body
PF: predicated region fallthrough
CT: control target
= control target key end

     0   :  { %s3031_s0 = inlined_call_operand.hbm [shape: f32[2,4,16,16], index: 0, kind: input, shape index: {}]   ;;  %s3032_s1 = inlined_call_operand.hbm [shape: f32[2,4,8,8], index: 1, kind: input, shape index: {}]   ;;  %s3033_s2 = inlined_call_operand.vmem [shape: f32[19,16], index: 2, kind: input, shape index: {}]   ;;  %s3034_s3 = inlined_call_operand.vmem [shape: f32[16,18], index: 3, kind: input, shape index: {}]   ;;  %s3035_s4 = inlined_call_operand.vmem [shape: f32[19,8], index: 4, kind: input, shape index: {}]   ;;  %s3036_s5 = inlined_call_operand.hbm [shape: f32[8,18], index: 5, kind: input, shape index: {}]   ;;  %s3037_s6 = inlined_call_operand.vmem [shape: f32[2,8,19,18], index: 6, kind: output, shape index: {}]  }
   0x1   :  { %3042 = sst [smem:[#allocation10_spill]] %s3031_s0 }
   0x2   :  { %11 = vsyncpa [#allocation3], 0 }
   0x3   :  { %13 = vsyncpa [#allocation3 + $0x1], 0 }
   0x4   :  { %14 = vsyncpa [#allocation5], 0 }
   0x5   :  { %16 = vsyncpa [#allocation5 + $0x1], 0  ;;  %s2557_s21 = smov 0   ;;  %s2559_s22 = smov 0  }
   0x6   :  { %s2561_s23 = smov 0   ;;  %s2563_s24 = smov 0  }
   0x7 LB: > { %s2576_s25 = sadd.s32 4294967295, %s2512_s24   ;;  %s2579_s26 = sadd.s32 1, %s2512_s24   ;;  %s2512_s24 = sphi %s2563_s24, %s3057_s24   ;;  %s2508_s23 = sphi %s2561_s23, %s3056_s23   ;;  %s2504_s22 = sphi %s2559_s22, %s3055_s22   ;;  %s2500_s21 = sphi %s2557_s21, %s3054_s21  }
   0x8   : > { %s26_s27 = ssub.s32 %s2512_s24, %s2579_s26  ;;  %s29_s28 = sadd.s32 1, %s2508_s23 }
   0x9   : > { %p27_p0 = scmp.eq.s32.totalorder %s26_s27, 0  ;;  %p36_p1 = scmp.ne.s32.totalorder %s2508_s23, %s2504_s22 }
   0xa   : > { %p37_p2 = scmp.eq.s32.totalorder %s2512_s24, 0  ;;  %p42_p3 = scmp.ne.s32.totalorder %s2504_s22, %s2500_s21 }
   0xb   : > { %s2589_s29 = scalar_select %p27_p0, %s2508_s23, %s29_s28  }
   0xc   : > { %p2591_p4 = por %p37_p2, %p36_p1  ;;  %p3038_p5 = scmp.eq.s32.totalorder %s2576_s25, 0 }
   0xd   : > { %p1937_p6 = scmp.ge.s32.totalorder %s2512_s24, 1  ;;  %p189_p7 = scmp.lt.s32.totalorder %s2512_s24, 3 }
   0xe   : > { %p2600_p8 = por %p3038_p5, %p42_p3  ;;  %s2514_s9 = smov [#allocation6]  }
   0xf   : > { %p2604_p9 = pnand %p1937_p6, %p189_p7  ;;  %s211_s10 = sshll.u32 %s2514_s9, 4  ;;  %s212_s10 = int_to_ptr.vmem [resolvable:$true] %s211_s10 }
  0x10   : > { %s3044_s7 = scalar_select %p2600_p8, 1, 0 }
  0x11   : > { %s3045_s8 = scalar_select %p2604_p9, 1, 0 }
  0x12   : > { %p2330_p10 = pneg %p2604_p9  ;;  %p2342_p11 = scmp.lt.s32.totalorder %s2512_s24, 2 }
  0x13   : > { %s2612_s11 = sand.u32 1, %s2508_s23   ;;  %s2382_s17 = scalar_lea.hbm %s3036_s5, 128 }
  0x14   : > { %p2616_p12 = pnand %p2330_p10, %p3038_p5  ;;  %p2622_p13 = pnand %p2342_p11, %p2591_p4 }
  0x15   : > { %s1940_s14 = sshll.u32 %s2612_s11, 6  ;;  %p2383_p0 = scmp.ne.s32.totalorder %s3036_s5, %s2382_s17 }
  0x16   : > { %s3047_s13 = scalar_select %p2622_p13, 1, 0 }
  0x17   : > { %p2384_p1 = pneg %p2616_p12  ;;  %p2389_p4 = scmp.lt.u32.totalorder %s2382_s17, %s3036_s5 }
  0x19   : > { %p2385_p2 = pnand %p2384_p1, %p2383_p0 }
  0x1b   : > { %p2386_p3 = pneg %p2385_p2 }
  0x1d   : > { %p2391_p6 = pnand %p2389_p4, %p2386_p3 }
  0x1f   : > { %2394 = shalt.err (!%p2391_p6)
}
  0x20   : > { %s2395_s27 = scalar_lea.vmem %s212_s10, 128  ;;  %p2403_p5 = scmp.lt.s32.totalorder %s212_s10, %s212_s10 }
  0x21   : > { %p2396_p7 = scmp.ne.s32.totalorder %s212_s10, %s2395_s27  ;;  %p2404_p8 = scmp.lt.s32.totalorder %s2395_s27, %s2395_s27 }
  0x23   : > { %p2398_p10 = pnand %p2396_p7, %p2384_p1  ;;  %p2405_p9 = por %p2404_p8, %p2403_p5 }
  0x25   : > { %p2399_p11 = pneg %p2398_p10 }
  0x27   : > { %p2406_p13 = pnand %p2405_p9, %p2399_p11 }
  0x29   : > { %2409 = shalt.err (!%p2406_p13)
}
  0x2a   : > { %2333 = dma.hbm_to_vmem [thread:$0]  (!%p2616_p12), %s3036_s5, 128, %s212_s10, [#allocation5]  }
  0x2b   : > { %s2031_s9 = sshll.u32 %s2512_s24, 10  ;;  %s3048_s0 = sld [smem:[#allocation10_spill]] }
  0x2c   : > { %s226_s12 = scalar_lea.vmem [#allocation2], %s1940_s14  ;;  %s243_s19 = sand.u32 1, %s2512_s24  }
  0x2d   : > { %s233_s18 = sshll.u32 %s226_s12, 4  ;;  %s223_s20 = scalar_lea.sflag [#allocation3], %s2612_s11  ;;  %s2649_s18 = int_to_ptr.vmem [resolvable:$true] %s233_s18 }
  0x2e   : > { %p3049_p8 = scmp.ne.s32.totalorder %s3047_s13, 0 }
  0x30   : > { %p2412_p9 = pneg %p3049_p8 }
  0x31   : > { %s2647_s17 = scalar_lea.hbm %s3048_s0, %s2031_s9  ;;  %s2415_s28 = scalar_lea.hbm %s3048_s0, 2048 }
  0x32   : > { %s2410_s21 = scalar_lea.hbm %s2647_s17, 1024  ;;  %p2416_p0 = scmp.lt.u32.totalorder %s2647_s17, %s3048_s0 }
  0x33   : > { %p2411_p5 = scmp.ne.s32.totalorder %s2647_s17, %s2410_s21  ;;  %p2417_p1 = scmp.lt.u32.totalorder %s2415_s28, %s2410_s21 }
  0x34   : > { %p2419_p3 = scmp.lt.u32.totalorder %s2410_s21, %s2647_s17 }
  0x35   : > { %p2413_p12 = pnand %p2412_p9, %p2411_p5  ;;  %p2418_p2 = por %p2417_p1, %p2416_p0 }
  0x37   : > { %p2414_p13 = pneg %p2413_p12  ;;  %p2420_p4 = por %p2419_p3, %p2418_p2 }
  0x39   : > { %p2421_p6 = pnand %p2420_p4, %p2414_p13 }
  0x3b   : > { %2424 = shalt.err (!%p2421_p6)
}
  0x3c   : > { %s2425_s14 = scalar_lea.vmem %s2649_s18, 1024  ;;  %s2515_s15 = smov [#allocation2]  }
  0x3d   : > { %p2426_p7 = scmp.ne.s32.totalorder %s2649_s18, %s2425_s14  ;;  %s2430_s16 = sshll.u32 %s2515_s15, 4  ;;  %s2431_s16 = int_to_ptr.vmem [resolvable:$false] %s2430_s16 }
  0x3e   : > { %s2432_s12 = scalar_lea.vmem %s2431_s16, 2048  ;;  %p2433_p5 = scmp.lt.s32.totalorder %s2649_s18, %s2431_s16 }
  0x3f   : > { %p2428_p10 = pnand %p2426_p7, %p2412_p9  ;;  %p2434_p12 = scmp.lt.s32.totalorder %s2432_s12, %s2425_s14 }
  0x41   : > { %p2429_p11 = pneg %p2428_p10  ;;  %p2435_p0 = por %p2434_p12, %p2433_p5 }
  0x43   : > { %p2436_p1 = pnand %p2435_p0, %p2429_p11 }
  0x45   : > { %2439 = shalt.err (!%p2436_p1)
}
  0x46   : > { %s2516_s21 = smov 128   ;;  %s2517_s10 = smov 8  }
  0x47   : > { %2337 = dma.hbm_to_vmem [thread:$0]  (!%p3049_p8), %s2647_s17, 1024, %s2649_s18, %s223_s20, %s2516_s21, %s2516_s21, %s2517_s10  }
  0x48   : > { %s1943_s27 = sshll.u32 %s2612_s11, 5  ;;  %s2032_s28 = sshll.u32 %s2512_s24, 9 }
  0x49   : > { %s2688_s14 = scalar_lea.hbm %s3032_s1, %s2032_s28  ;;  %s247_s15 = scalar_lea.vmem [#allocation4], %s1943_s27 }
  0x4a   : > { %s254_s16 = sshll.u32 %s247_s15, 4  ;;  %s2694_s12 = scalar_lea.sflag [#allocation5], %s243_s19  ;;  %s2690_s16 = int_to_ptr.vmem [resolvable:$true] %s254_s16 }
  0x4b   : > { %s2440_s0 = scalar_lea.hbm %s2688_s14, 512  ;;  %s2445_s18 = scalar_lea.hbm %s3032_s1, 1024 }
  0x4c   : > { %p2441_p13 = scmp.ne.s32.totalorder %s2688_s14, %s2440_s0  ;;  %p2446_p4 = scmp.lt.u32.totalorder %s2688_s14, %s3032_s1 }
  0x4d   : > { %p2447_p6 = scmp.lt.u32.totalorder %s2445_s18, %s2440_s0  ;;  %p2449_p10 = scmp.lt.u32.totalorder %s2440_s0, %s2688_s14 }
  0x4e   : > { %p2443_p2 = pnand %p2441_p13, %p2412_p9 }
  0x4f   : > { %p2448_p7 = por %p2447_p6, %p2446_p4 }
  0x50   : > { %p2444_p3 = pneg %p2443_p2 }
  0x51   : > { %p2450_p11 = por %p2449_p10, %p2448_p7 }
  0x53   : > { %p2451_p5 = pnand %p2450_p11, %p2444_p3 }
  0x55   : > { %2454 = shalt.err (!%p2451_p5)
}
  0x56   : > { %s2455_s24 = scalar_lea.vmem %s2690_s16, 512  ;;  %s2518_s19 = smov [#allocation4]  }
  0x57   : > { %p2456_p12 = scmp.ne.s32.totalorder %s2690_s16, %s2455_s24  ;;  %s2460_s27 = sshll.u32 %s2518_s19, 4  ;;  %s2461_s27 = int_to_ptr.vmem [resolvable:$false] %s2460_s27 }
  0x58   : > { %s2462_s30 = scalar_lea.vmem %s2461_s27, 1024  ;;  %p2463_p13 = scmp.lt.s32.totalorder %s2690_s16, %s2461_s27 }
  0x59   : > { %p2458_p0 = pnand %p2456_p12, %p2412_p9  ;;  %p2464_p2 = scmp.lt.s32.totalorder %s2462_s30, %s2455_s24 }
  0x5b   : > { %p2459_p1 = pneg %p2458_p0  ;;  %p2465_p4 = por %p2464_p2, %p2463_p13 }
  0x5d   : > { %p2466_p6 = pnand %p2465_p4, %p2459_p1 }
  0x5f   : > { %2469 = shalt.err (!%p2466_p6)
}
  0x60   : > { %2340 = dma.hbm_to_vmem [thread:$0]  (!%p3049_p8), %s2688_s14, 512, %s2690_s16, %s2694_s12, %s2516_s21, %s2516_s21, %s2517_s10  }
  0x61   : > { %p3050_p9 = scmp.ne.s32.totalorder %s3045_s8, 0 }
  0x62   : > { %s268_s0 = sand.u32 (!%p3050_p9), 1, %s2504_s22   ;;  %p3051_p3 = scmp.ne.s32.totalorder (!%p3050_p9), %s3044_s7, 0 }
  0x63   : > { %266 = sbr.rel (%p3050_p9) target bundleno = 636 (0x27c), region = 44  ;;  %s1947_s9 = sshll.u32 (!%p3050_p9), %s268_s0, 6 }
  0x64   : > { %s269_s15 = scalar_lea.sflag (!%p3050_p9), [#allocation3], %s268_s0  ;;  %s2726_s11 = scalar_lea.vmem (!%p3050_p9), [#allocation2], %s1947_s9 }
  0x6a   : > { %2487 = dma.done.wait (%p3051_p3), %s269_s15, 1024  }
  0x6b   : > { %2489 = vsyncadd (%p3051_p3), %s269_s15, 4294966272  ;;  %s277_s13 = sand.u32 1, %s2576_s25   ;;  %s1948_s17 = sshll.u32 %s268_s0, 5 }
  0x6c   : > { %s278_s21 = scalar_lea.sflag [#allocation5], %s277_s13  ;;  %s2733_s10 = scalar_lea.vmem [#allocation4], %s1948_s17 }
  0x6d   : > { %2491 = dma.done.wait (%p3051_p3), %s278_s21, 512  }
  0x6e   : > { %2493 = vsyncadd (%p3051_p3), %s278_s21, 4294966784  ;;  %p3052_p8 = scmp.eq.s32.totalorder %s2576_s25, 0 }
  0x70   : > { %2495 = dma.done.wait (%p3052_p8), [#allocation5], 128   ;;  %p3053_p7 = pmov %p3052_p8 }
  0x71   : > { %v2519_v0 = vmov 0.0|0.0   ;;  %vm2520_vm0 = vmmov 0   ;;  %v2521_v1 = vmov 0.0   ;;  %v327_v2 = vld [vmem:[%s2726_s11] sm:$0xff]  ;;  %v328_v3 = vld [vmem:[%s2726_s11 + $0x8] sm:$0xff]  ;;  %v1957_v5 = vld [vmem:[%s2726_s11 + $0x10] sm:$0xff] }
  0x72   : > { %2497 = vsyncadd (%p3053_p7), [#allocation5], 4294967168  ;;  %2297 = vmatprep.subr.bf16.mxu0 %v2519_v0  ;;  %2109 = vmatprep.mubr.msk.f32.mxu0 %vm2520_vm0, %v2521_v1  ;;  %v2298_v4 = vpack.c.bf16 %v328_v3, %v327_v2  ;;  %v1958_v6 = vld [vmem:[%s2726_s11 + $0x18] sm:$0xff]  ;;  %v324_v7 = vld [vmem:[%s3033_s2] sm:$0xff]  ;;  %vm329_vm1 = vcmask 130048   ;;  %vm1089_vm2 = vcmask 64512  }
  0x73   : > { %2300 = vmatprep.subr.bf16.mxu1 %v2519_v0  ;;  %2122 = vmatprep.mubr.msk.f32.mxu1 %vm2520_vm0, %v2521_v1  ;;  %v2304_v8 = vpack.c.bf16 %v1958_v6, %v1957_v5  ;;  %v325_v9 = vld [vmem:[%s3033_s2 + $0x8] sm:$0xff]  ;;  %v419_v10 = vld [vmem:[%s3034_s3] sm:$0xff]  ;;  %v326_v13 = vld [vmem:[%s3033_s2 + $0x10] sm:$0x7]  ;;  %p319_p10 = scmp.lt.s32.totalorder %s2576_s25, 1  ;;  %vm510_vm3 = vcmask 146432  }
  0x74   : > { %2299 = vmatpush3.bf16.msra.mxu0 %v2298_v4  ;;  %v420_v11 = vld [vmem:[%s3034_s3 + $0x8] sm:$0xff]  ;;  %v1968_v14 = vld [vmem:[%s2726_s11 + $0x20] sm:$0xff]  ;;  %v517_v17 = vld [vmem:[%s3033_s2 + $0x10] sm:$0x7]  ;;  %vm513_vm4 = vcmask 141312  }
  0x75   : > { %2303 = vmatprep.subr.bf16.mxu0 %v2519_v0  ;;  %v2770_v12 = vpack.c.bf16 %v420_v11, %v419_v10  ;;  %v1969_v15 = vld [vmem:[%s2726_s11 + $0x28] sm:$0xff]  ;;  %v1979_v18 = vld [vmem:[%s2726_s11 + $0x30] sm:$0xff]  ;;  %v1980_v19 = vld [vmem:[%s2726_s11 + $0x38] sm:$0xff]  ;;  %s3059_s25 = smov (!%p319_p10, %s2576_s25), 1 }
  0x76   : > { %v2310_v16 = vpack.c.bf16 %v1969_v15, %v1968_v14  ;;  %v2316_v20 = vpack.c.bf16 %v1980_v19, %v1979_v18  ;;  %v707_v21 = vld [vmem:[%s3033_s2 + $0x10] sm:$0x7]  ;;  %v1088_v22 = vld [vmem:[%s2733_s10] sm:$0xff]  ;;  %v1999_v25 = vld [vmem:[%s2733_s10 + $0x8] sm:$0xff]  ;;  %s2321_s24 = smul.u32 192, %s3059_s25 }
  0x77   : > { %2110 = vmatmul.mubr.msk.f32.vlgmr.msra.gmra.mrb[0].mxu0 %vm329_vm1, %v324_v7  ;;  %2302 = vmatpush3.bf16.msra.mxu1 %v2770_v12  ;;  %v897_v23 = vld [vmem:[%s3033_s2 + $0x10] sm:$0x7]  ;;  %v1085_v24 = vld [vmem:[%s3035_s4] sm:$0xff]  ;;  %v1086_v26 = vld [vmem:[%s3035_s4 + $0x8] sm:$0xff] }
  0x78   : > { %2305 = vmatpush3.bf16.msra.mxu0 %v2304_v8  ;;  %2112 = vmatprep.mubr.msk.f32.mxu0 %vm2520_vm0, %v2521_v1  ;;  %v1087_v27 = vld [vmem:[%s3035_s4 + $0x10] sm:$0x7]  ;;  %v2019_v30 = vld [vmem:[%s2733_s10 + $0x18] sm:$0xff]  ;;  %v1179_v51 = vld [vmem:[#allocation6] sm:$0xff]  ;;  %s2968_s30 = scalar_lea.vmem %s3037_s6, %s2321_s24 }
  0x79   : > { %2309 = vmatprep.subr.bf16.mxu0 %v2519_v0  ;;  %2306 = vmatprep.subr.bf16.mxu1 %v2519_v0  ;;  %v2009_v28 = vld [vmem:[%s2733_s10 + $0x10] sm:$0xff] }
  0x7a   : > { %v1275_v29 = vld [vmem:[%s3035_s4 + $0x10] sm:$0x7] }
  0x7b   : > { %2113 = vmatmul.mubr.msk.f32.gmra.mrb[2].mxu0 %vm329_vm1, %v325_v9  ;;  %v1463_v31 = vld [vmem:[%s3035_s4 + $0x10] sm:$0x7] }
  0x7c   : > { %2115 = vmatprep.mubr.msk.f32.mxu0 %vm2520_vm0, %v2521_v1  ;;  %v1651_v32 = vld [vmem:[%s3035_s4 + $0x10] sm:$0x7] }
  0x7f   : > { %2116 = vmatmul.mubr.msk.f32.gmra.mrb[4].mxu0 %vm329_vm1, %v326_v13 }
  0x80   : > { %2135 = vmatprep.mubr.msk.f32.mxu0 %vm2520_vm0, %v2521_v1 }
  0x83   : > { %2136 = vmatmul.mubr.msk.f32.vlgmr.msra.gmra.mrb[6].mxu0 %vm329_vm1, %v324_v7 }
  0x84   : > { %2311 = vmatpush3.bf16.msra.mxu0 %v2310_v16  ;;  %2138 = vmatprep.mubr.msk.f32.mxu0 %vm2520_vm0, %v2521_v1 }
  0x85   : > { %2315 = vmatprep.subr.bf16.mxu0 %v2519_v0 }
  0x87   : > { %2139 = vmatmul.mubr.msk.f32.gmra.mrb[8].mxu0 %vm329_vm1, %v325_v9 }
  0x88   : > { %2141 = vmatprep.mubr.msk.f32.mxu0 %vm2520_vm0, %v2521_v1 }
  0x8b   : > { %2142 = vmatmul.mubr.msk.f32.gmra.mrb[10].mxu0 %vm329_vm1, %v517_v17 }
  0x8c   : > { %2161 = vmatprep.mubr.msk.f32.mxu0 %vm2520_vm0, %v2521_v1 }
  0x8f   : > { %2162 = vmatmul.mubr.msk.f32.vlgmr.msra.gmra.mrb[12].mxu0 %vm329_vm1, %v324_v7 }
  0x90   : > { %2317 = vmatpush3.bf16.msra.mxu0 %v2316_v20  ;;  %2164 = vmatprep.mubr.msk.f32.mxu0 %vm2520_vm0, %v2521_v1 }
  0x91   : > { %2209 = vmatprep.subr.mxu0 %v2521_v1 }
  0x93   : > { %2165 = vmatmul.mubr.msk.f32.gmra.mrb[14].mxu0 %vm329_vm1, %v325_v9 }
  0x94   : > { %2167 = vmatprep.mubr.msk.f32.mxu0 %vm2520_vm0, %v2521_v1 }
  0x97   : > { %2168 = vmatmul.mubr.msk.f32.gmra.mrb[16].mxu0 %vm329_vm1, %v707_v21 }
  0x98   : > { %2187 = vmatprep.mubr.msk.f32.mxu0 %vm2520_vm0, %v2521_v1 }
  0x9b   : > { %2188 = vmatmul.mubr.msk.f32.vlgmr.msra.gmra.mrb[18].mxu0 %vm329_vm1, %v324_v7 }
  0x9c   : > { %2210 = vmatpush3.msra.mxu0 %v1088_v22  ;;  %2190 = vmatprep.mubr.msk.f32.mxu0 %vm2520_vm0, %v2521_v1 }
  0x9d   : > { %2231 = vmatprep.subr.mxu0 %v2521_v1 }
  0x9f   : > { %2191 = vmatmul.mubr.msk.f32.gmra.mrb[20].mxu0 %vm329_vm1, %v325_v9 }
  0xa0   : > { %2193 = vmatprep.mubr.msk.f32.mxu0 %vm2520_vm0, %v2521_v1 }
  0xa3   : > { %2194 = vmatmul.mubr.msk.f32.gmra.mrb[22].mxu0 %vm329_vm1, %v897_v23 }
  0xa4   : > { %2211 = vmatprep.mubr.msk.f32.mxu0 %vm2520_vm0, %v2521_v1 }
  0xa7   : > { %2212 = vmatmul.mubr.msk.f32.vlgmr.msra.gmra.mrb[24].mxu0 %vm1089_vm2, %v1085_v24 }
  0xa8   : > { %2232 = vmatpush3.msra.mxu0 %v1999_v25  ;;  %2214 = vmatprep.mubr.msk.f32.mxu0 %vm2520_vm0, %v2521_v1 }
  0xa9   : > { %2253 = vmatprep.subr.mxu0 %v2521_v1 }
  0xab   : > { %2215 = vmatmul.mubr.msk.f32.gmra.mrb[26].mxu0 %vm1089_vm2, %v1086_v26 }
  0xac   : > { %2217 = vmatprep.mubr.msk.f32.mxu0 %vm2520_vm0, %v2521_v1 }
  0xaf   : > { %2218 = vmatmul.mubr.msk.f32.gmra.mrb[28].mxu0 %vm1089_vm2, %v1087_v27 }
  0xb0   : > { %2233 = vmatprep.mubr.msk.f32.mxu0 %vm2520_vm0, %v2521_v1 }
  0xb3   : > { %2234 = vmatmul.mubr.msk.f32.vlgmr.msra.gmra.mrb[30].mxu0 %vm1089_vm2, %v1085_v24 }
  0xb4   : > { %2254 = vmatpush3.msra.mxu0 %v2009_v28  ;;  %2236 = vmatprep.mubr.msk.f32.mxu0 %vm2520_vm0, %v2521_v1 }
  0xb5   : > { %2275 = vmatprep.subr.mxu0 %v2521_v1 }
  0xb7   : > { %2237 = vmatmul.mubr.msk.f32.gmra.mrb[32].mxu0 %vm1089_vm2, %v1086_v26 }
  0xb8   : > { %2239 = vmatprep.mubr.msk.f32.mxu0 %vm2520_vm0, %v2521_v1 }
  0xbb   : > { %2240 = vmatmul.mubr.msk.f32.gmra.mrb[34].mxu0 %vm1089_vm2, %v1275_v29 }
  0xbc   : > { %2255 = vmatprep.mubr.msk.f32.mxu0 %vm2520_vm0, %v2521_v1 }
  0xbf   : > { %2256 = vmatmul.mubr.msk.f32.vlgmr.msra.gmra.mrb[36].mxu0 %vm1089_vm2, %v1085_v24 }
  0xc0   : > { %2276 = vmatpush3.msra.mxu0 %v2019_v30  ;;  %2258 = vmatprep.mubr.msk.f32.mxu0 %vm2520_vm0, %v2521_v1 }
  0xc3   : > { %2259 = vmatmul.mubr.msk.f32.gmra.mrb[38].mxu0 %vm1089_vm2, %v1086_v26 }
  0xc4   : > { %2261 = vmatprep.mubr.msk.f32.mxu0 %vm2520_vm0, %v2521_v1 }
  0xc7   : > { %2262 = vmatmul.mubr.msk.f32.gmra.mrb[40].mxu0 %vm1089_vm2, %v1463_v31 }
  0xc8   : > { %2277 = vmatprep.mubr.msk.f32.mxu0 %vm2520_vm0, %v2521_v1 }
  0xcb   : > { %2278 = vmatmul.mubr.msk.f32.vlgmr.msra.gmra.mrb[42].mxu0 %vm1089_vm2, %v1085_v24 }
  0xcc   : > { %2280 = vmatprep.mubr.msk.f32.mxu0 %vm2520_vm0, %v2521_v1 }
  0xcf   : > { %2281 = vmatmul.mubr.msk.f32.gmra.mrb[44].mxu0 %vm1089_vm2, %v1086_v26 }
  0xd0   : > { %2283 = vmatprep.mubr.msk.f32.mxu0 %vm2520_vm0, %v2521_v1 }
  0xd3   : > { %2284 = vmatmul.mubr.msk.f32.gmra.mrb[46].mxu0 %vm1089_vm2, %v1651_v32 }
 0x14a   : > { %v405_v33 = vpop.f32.mrb[0].mxu0 }
 0x14b   : > { %v2111_v34 = vpop.f32.mrb[1].mxu0  ;;  %2123 = vmatmul.mubr.msk.f32.vlgmr.msra.gmra.mrb[0].mxu1 %vm329_vm1, %v405_v33 }
 0x14c   : > { %2308 = vmatpush3.bf16.msra.mxu1 %v2770_v12  ;;  %2125 = vmatprep.mubr.msk.f32.mxu1 %vm2520_vm0, %v2521_v1 }
 0x14d   : > { %2312 = vmatprep.subr.bf16.mxu1 %v2519_v0 }
 0x14e   : > { %v410_v35 = vpop.f32.mrb[2].mxu0 }
 0x14f   : > { %v2114_v36 = vpop.f32.mrb[3].mxu0  ;;  %2126 = vmatmul.mubr.msk.f32.gmra.mrb[2].mxu1 %vm329_vm1, %v410_v35 }
 0x150   : > { %2128 = vmatprep.mubr.msk.f32.mxu1 %vm2520_vm0, %v2521_v1 }
 0x152   : > { %v415_v37 = vpop.f32.mrb[4].mxu0 }
 0x153   : > { %v2117_v38 = vpop.f32.mrb[5].mxu0  ;;  %2129 = vmatmul.mubr.msk.f32.gmra.mrb[4].mxu1 %vm329_vm1, %v415_v37 }
 0x154   : > { %2148 = vmatprep.mubr.msk.f32.mxu1 %vm2520_vm0, %v2521_v1 }
 0x156   : > { %v596_v39 = vpop.f32.mrb[6].mxu0 }
 0x157   : > { %v2137_v40 = vpop.f32.mrb[7].mxu0  ;;  %2149 = vmatmul.mubr.msk.f32.vlgmr.msra.gmra.mrb[6].mxu1 %vm329_vm1, %v596_v39 }
 0x158   : > { %2314 = vmatpush3.bf16.msra.mxu1 %v2770_v12  ;;  %2151 = vmatprep.mubr.msk.f32.mxu1 %vm2520_vm0, %v2521_v1 }
 0x159   : > { %2318 = vmatprep.subr.bf16.mxu1 %v2519_v0 }
 0x15a   : > { %v601_v41 = vpop.f32.mrb[8].mxu0 }
 0x15b   : > { %v2140_v42 = vpop.f32.mrb[9].mxu0  ;;  %2152 = vmatmul.mubr.msk.f32.gmra.mrb[8].mxu1 %vm329_vm1, %v601_v41 }
 0x15c   : > { %2154 = vmatprep.mubr.msk.f32.mxu1 %vm2520_vm0, %v2521_v1 }
 0x15e   : > { %v606_v43 = vpop.f32.mrb[10].mxu0 }
 0x15f   : > { %v2143_v44 = vpop.f32.mrb[11].mxu0  ;;  %2155 = vmatmul.mubr.msk.f32.gmra.mrb[10].mxu1 %vm329_vm1, %v606_v43 }
 0x160   : > { %2174 = vmatprep.mubr.msk.f32.mxu1 %vm2520_vm0, %v2521_v1 }
 0x162   : > { %v786_v45 = vpop.f32.mrb[12].mxu0 }
 0x163   : > { %v2163_v46 = vpop.f32.mrb[13].mxu0  ;;  %2175 = vmatmul.mubr.msk.f32.vlgmr.msra.gmra.mrb[12].mxu1 %vm329_vm1, %v786_v45 }
 0x164   : > { %2320 = vmatpush3.bf16.msra.mxu1 %v2770_v12  ;;  %2177 = vmatprep.mubr.msk.f32.mxu1 %vm2520_vm0, %v2521_v1 }
 0x165   : > { %2220 = vmatprep.subr.mxu1 %v2521_v1 }
 0x166   : > { %v791_v47 = vpop.f32.mrb[14].mxu0 }
 0x167   : > { %v2166_v48 = vpop.f32.mrb[15].mxu0  ;;  %2178 = vmatmul.mubr.msk.f32.gmra.mrb[14].mxu1 %vm329_vm1, %v791_v47 }
 0x168   : > { %2180 = vmatprep.mubr.msk.f32.mxu1 %vm2520_vm0, %v2521_v1 }
 0x16a   : > { %v796_v49 = vpop.f32.mrb[16].mxu0 }
 0x16b   : > { %v2169_v50 = vpop.f32.mrb[17].mxu0  ;;  %2181 = vmatmul.mubr.msk.f32.gmra.mrb[16].mxu1 %vm329_vm1, %v796_v49 }
 0x16c   : > { %2200 = vmatprep.mubr.msk.f32.mxu1 %vm2520_vm0, %v2521_v1 }
 0x16e   : > { %v976_v52 = vpop.f32.mrb[18].mxu0 }
 0x16f   : > { %v2189_v53 = vpop.f32.mrb[19].mxu0  ;;  %2201 = vmatmul.mubr.msk.f32.vlgmr.msra.gmra.mrb[18].mxu1 %vm329_vm1, %v976_v52 }
 0x170   : > { %2221 = vmatpush3.msra.mxu1 %v1179_v51  ;;  %2203 = vmatprep.mubr.msk.f32.mxu1 %vm2520_vm0, %v2521_v1 }
 0x171   : > { %2242 = vmatprep.subr.mxu1 %v2521_v1 }
 0x172   : > { %v981_v54 = vpop.f32.mrb[20].mxu0 }
 0x173   : > { %v2192_v55 = vpop.f32.mrb[21].mxu0  ;;  %2204 = vmatmul.mubr.msk.f32.gmra.mrb[20].mxu1 %vm329_vm1, %v981_v54 }
 0x174   : > { %2206 = vmatprep.mubr.msk.f32.mxu1 %vm2520_vm0, %v2521_v1 }
 0x176   : > { %v986_v56 = vpop.f32.mrb[22].mxu0 }
 0x177   : > { %v2195_v57 = vpop.f32.mrb[23].mxu0  ;;  %2207 = vmatmul.mubr.msk.f32.gmra.mrb[22].mxu1 %vm329_vm1, %v986_v56 }
 0x178   : > { %2222 = vmatprep.mubr.msk.f32.mxu1 %vm2520_vm0, %v2521_v1 }
 0x17a   : > { %v1165_v58 = vpop.f32.mrb[24].mxu0 }
 0x17b   : > { %v2213_v59 = vpop.f32.mrb[25].mxu0  ;;  %2223 = vmatmul.mubr.msk.f32.vlgmr.msra.gmra.mrb[24].mxu1 %vm1089_vm2, %v1165_v58 }
 0x17c   : > { %2243 = vmatpush3.msra.mxu1 %v1179_v51  ;;  %2225 = vmatprep.mubr.msk.f32.mxu1 %vm2520_vm0, %v2521_v1 }
 0x17d   : > { %2264 = vmatprep.subr.mxu1 %v2521_v1 }
 0x17e   : > { %v1170_v60 = vpop.f32.mrb[26].mxu0 }
 0x17f   : > { %v2216_v61 = vpop.f32.mrb[27].mxu0  ;;  %2226 = vmatmul.mubr.msk.f32.gmra.mrb[26].mxu1 %vm1089_vm2, %v1170_v60 }
 0x180   : > { %2228 = vmatprep.mubr.msk.f32.mxu1 %vm2520_vm0, %v2521_v1 }
 0x182   : > { %v1175_v62 = vpop.f32.mrb[28].mxu0 }
 0x183   : > { %v2219_v63 = vpop.f32.mrb[29].mxu0  ;;  %2229 = vmatmul.mubr.msk.f32.gmra.mrb[28].mxu1 %vm1089_vm2, %v1175_v62 }
 0x184   : > { %2244 = vmatprep.mubr.msk.f32.mxu1 %vm2520_vm0, %v2521_v1 }
 0x186   : > { %v1353_v0 = vpop.f32.mrb[30].mxu0 }
 0x187   : > { %v2235_v2 = vpop.f32.mrb[31].mxu0  ;;  %2245 = vmatmul.mubr.msk.f32.vlgmr.msra.gmra.mrb[30].mxu1 %vm1089_vm2, %v1353_v0 }
 0x188   : > { %2265 = vmatpush3.msra.mxu1 %v1179_v51  ;;  %2247 = vmatprep.mubr.msk.f32.mxu1 %vm2520_vm0, %v2521_v1 }
 0x189   : > { %2286 = vmatprep.subr.mxu1 %v2521_v1 }
 0x18a   : > { %v1358_v3 = vpop.f32.mrb[32].mxu0 }
 0x18b   : > { %v2238_v4 = vpop.f32.mrb[33].mxu0  ;;  %2248 = vmatmul.mubr.msk.f32.gmra.mrb[32].mxu1 %vm1089_vm2, %v1358_v3 }
 0x18c   : > { %2250 = vmatprep.mubr.msk.f32.mxu1 %vm2520_vm0, %v2521_v1 }
 0x18e   : > { %v1363_v5 = vpop.f32.mrb[34].mxu0 }
 0x18f   : > { %v2241_v6 = vpop.f32.mrb[35].mxu0  ;;  %2251 = vmatmul.mubr.msk.f32.gmra.mrb[34].mxu1 %vm1089_vm2, %v1363_v5 }
 0x190   : > { %2266 = vmatprep.mubr.msk.f32.mxu1 %vm2520_vm0, %v2521_v1 }
 0x192   : > { %v1541_v7 = vpop.f32.mrb[36].mxu0 }
 0x193   : > { %v2257_v8 = vpop.f32.mrb[37].mxu0  ;;  %2267 = vmatmul.mubr.msk.f32.vlgmr.msra.gmra.mrb[36].mxu1 %vm1089_vm2, %v1541_v7 }
 0x194   : > { %2287 = vmatpush3.msra.mxu1 %v1179_v51  ;;  %2269 = vmatprep.mubr.msk.f32.mxu1 %vm2520_vm0, %v2521_v1 }
 0x196   : > { %v1546_v9 = vpop.f32.mrb[38].mxu0 }
 0x197   : > { %v2260_v10 = vpop.f32.mrb[39].mxu0  ;;  %2270 = vmatmul.mubr.msk.f32.gmra.mrb[38].mxu1 %vm1089_vm2, %v1546_v9 }
 0x198   : > { %2272 = vmatprep.mubr.msk.f32.mxu1 %vm2520_vm0, %v2521_v1 }
 0x19a   : > { %v1551_v11 = vpop.f32.mrb[40].mxu0 }
 0x19b   : > { %v2263_v12 = vpop.f32.mrb[41].mxu0  ;;  %2273 = vmatmul.mubr.msk.f32.gmra.mrb[40].mxu1 %vm1089_vm2, %v1551_v11 }
 0x19c   : > { %2288 = vmatprep.mubr.msk.f32.mxu1 %vm2520_vm0, %v2521_v1 }
 0x19e   : > { %v1729_v13 = vpop.f32.mrb[42].mxu0 }
 0x19f   : > { %v2279_v14 = vpop.f32.mrb[43].mxu0  ;;  %2289 = vmatmul.mubr.msk.f32.vlgmr.msra.gmra.mrb[42].mxu1 %vm1089_vm2, %v1729_v13 }
 0x1a0   : > { %2291 = vmatprep.mubr.msk.f32.mxu1 %vm2520_vm0, %v2521_v1 }
 0x1a2   : > { %v1734_v15 = vpop.f32.mrb[44].mxu0 }
 0x1a3   : > { %v2282_v16 = vpop.f32.mrb[45].mxu0  ;;  %2292 = vmatmul.mubr.msk.f32.gmra.mrb[44].mxu1 %vm1089_vm2, %v1734_v15 }
 0x1a4   : > { %2294 = vmatprep.mubr.msk.f32.mxu1 %vm2520_vm0, %v2521_v1 }
 0x1a6   : > { %v1739_v17 = vpop.f32.mrb[46].mxu0 }
 0x1a7   : > { %v2285_v18 = vpop.f32.mrb[47].mxu0  ;;  %2295 = vmatmul.mubr.msk.f32.gmra.mrb[46].mxu1 %vm1089_vm2, %v1739_v17 }
 0x21e   : > { %v496_v19 = vpop.f32.mrb[0].mxu1 }
 0x21f   : > { %511 = vst.msk [vmem:[%s2968_s30] sm:$0xff] %vm510_vm3, %v496_v19  ;;  %v2124_v1 = vpop.f32.mrb[1].mxu1 }
 0x222   : > { %v501_v20 = vpop.f32.mrb[2].mxu1 }
 0x223   : > { %512 = vst.msk [vmem:[%s2968_s30 + $0x8] sm:$0xff] %vm510_vm3, %v501_v20  ;;  %v2127_v21 = vpop.f32.mrb[3].mxu1 }
 0x226   : > { %v506_v22 = vpop.f32.mrb[4].mxu1 }
 0x227   : > { %514 = vst.msk [vmem:[%s2968_s30 + $0x10] sm:$0x7] %vm513_vm4, %v506_v22  ;;  %v2130_v23 = vpop.f32.mrb[5].mxu1 }
 0x22a   : > { %v687_v24 = vpop.f32.mrb[6].mxu1 }
 0x22b   : > { %1965 = vst.msk [vmem:[%s2968_s30 + $0x18] sm:$0xff] %vm510_vm3, %v687_v24  ;;  %v2150_v25 = vpop.f32.mrb[7].mxu1 }
 0x22e   : > { %v692_v26 = vpop.f32.mrb[8].mxu1 }
 0x22f   : > { %1966 = vst.msk [vmem:[%s2968_s30 + $0x20] sm:$0xff] %vm510_vm3, %v692_v26  ;;  %v2153_v27 = vpop.f32.mrb[9].mxu1 }
 0x232   : > { %v697_v28 = vpop.f32.mrb[10].mxu1 }
 0x233   : > { %1967 = vst.msk [vmem:[%s2968_s30 + $0x28] sm:$0x7] %vm513_vm4, %v697_v28  ;;  %v2156_v29 = vpop.f32.mrb[11].mxu1 }
 0x236   : > { %v877_v30 = vpop.f32.mrb[12].mxu1 }
 0x237   : > { %1976 = vst.msk [vmem:[%s2968_s30 + $0x30] sm:$0xff] %vm510_vm3, %v877_v30  ;;  %v2176_v31 = vpop.f32.mrb[13].mxu1 }
 0x23a   : > { %v882_v32 = vpop.f32.mrb[14].mxu1 }
 0x23b   : > { %1977 = vst.msk [vmem:[%s2968_s30 + $0x38] sm:$0xff] %vm510_vm3, %v882_v32  ;;  %v2179_v33 = vpop.f32.mrb[15].mxu1 }
 0x23e   : > { %v887_v34 = vpop.f32.mrb[16].mxu1 }
 0x23f   : > { %1978 = vst.msk [vmem:[%s2968_s30 + $0x40] sm:$0x7] %vm513_vm4, %v887_v34  ;;  %v2182_v35 = vpop.f32.mrb[17].mxu1 }
 0x242   : > { %v1067_v36 = vpop.f32.mrb[18].mxu1 }
 0x243   : > { %1987 = vst.msk [vmem:[%s2968_s30 + $0x48] sm:$0xff] %vm510_vm3, %v1067_v36  ;;  %v2202_v37 = vpop.f32.mrb[19].mxu1 }
 0x246   : > { %v1072_v38 = vpop.f32.mrb[20].mxu1 }
 0x247   : > { %1988 = vst.msk [vmem:[%s2968_s30 + $0x50] sm:$0xff] %vm510_vm3, %v1072_v38  ;;  %v2205_v39 = vpop.f32.mrb[21].mxu1 }
 0x24a   : > { %v1077_v40 = vpop.f32.mrb[22].mxu1 }
 0x24b   : > { %1989 = vst.msk [vmem:[%s2968_s30 + $0x58] sm:$0x7] %vm513_vm4, %v1077_v40  ;;  %v2208_v41 = vpop.f32.mrb[23].mxu1 }
 0x24e   : > { %v1255_v42 = vpop.f32.mrb[24].mxu1 }
 0x24f   : > { %1996 = vst.msk [vmem:[%s2968_s30 + $0x60] sm:$0xff] %vm510_vm3, %v1255_v42  ;;  %v2224_v43 = vpop.f32.mrb[25].mxu1 }
 0x252   : > { %v1260_v44 = vpop.f32.mrb[26].mxu1 }
 0x253   : > { %1997 = vst.msk [vmem:[%s2968_s30 + $0x68] sm:$0xff] %vm510_vm3, %v1260_v44  ;;  %v2227_v45 = vpop.f32.mrb[27].mxu1 }
 0x256   : > { %v1265_v46 = vpop.f32.mrb[28].mxu1 }
 0x257   : > { %1998 = vst.msk [vmem:[%s2968_s30 + $0x70] sm:$0x7] %vm513_vm4, %v1265_v46  ;;  %v2230_v47 = vpop.f32.mrb[29].mxu1 }
 0x25a   : > { %v1443_v48 = vpop.f32.mrb[30].mxu1 }
 0x25b   : > { %2006 = vst.msk [vmem:[%s2968_s30 + $0x78] sm:$0xff] %vm510_vm3, %v1443_v48  ;;  %v2246_v49 = vpop.f32.mrb[31].mxu1 }
 0x25e   : > { %v1448_v50 = vpop.f32.mrb[32].mxu1 }
 0x25f   : > { %2007 = vst.msk [vmem:[%s2968_s30 + $0x80] sm:$0xff] %vm510_vm3, %v1448_v50  ;;  %v2249_v51 = vpop.f32.mrb[33].mxu1 }
 0x262   : > { %v1453_v52 = vpop.f32.mrb[34].mxu1 }
 0x263   : > { %2008 = vst.msk [vmem:[%s2968_s30 + $0x88] sm:$0x7] %vm513_vm4, %v1453_v52  ;;  %v2252_v53 = vpop.f32.mrb[35].mxu1 }
 0x266   : > { %v1631_v54 = vpop.f32.mrb[36].mxu1 }
 0x267   : > { %2016 = vst.msk [vmem:[%s2968_s30 + $0x90] sm:$0xff] %vm510_vm3, %v1631_v54  ;;  %v2268_v55 = vpop.f32.mrb[37].mxu1 }
 0x26a   : > { %v1636_v56 = vpop.f32.mrb[38].mxu1 }
 0x26b   : > { %2017 = vst.msk [vmem:[%s2968_s30 + $0x98] sm:$0xff] %vm510_vm3, %v1636_v56  ;;  %v2271_v57 = vpop.f32.mrb[39].mxu1 }
 0x26e   : > { %v1641_v58 = vpop.f32.mrb[40].mxu1 }
 0x26f   : > { %2018 = vst.msk [vmem:[%s2968_s30 + $0xa0] sm:$0x7] %vm513_vm4, %v1641_v58  ;;  %v2274_v59 = vpop.f32.mrb[41].mxu1 }
 0x272   : > { %v1819_v60 = vpop.f32.mrb[42].mxu1 }
 0x273   : > { %2026 = vst.msk [vmem:[%s2968_s30 + $0xa8] sm:$0xff] %vm510_vm3, %v1819_v60  ;;  %v2290_v61 = vpop.f32.mrb[43].mxu1 }
 0x276   : > { %v1824_v62 = vpop.f32.mrb[44].mxu1 }
 0x277   : > { %2027 = vst.msk [vmem:[%s2968_s30 + $0xb0] sm:$0xff] %vm510_vm3, %v1824_v62  ;;  %v2293_v63 = vpop.f32.mrb[45].mxu1 }
 0x27a   : > { %v1829_v0 = vpop.f32.mrb[46].mxu1 }
 0x27b   : > { %2028 = vst.msk [vmem:[%s2968_s30 + $0xb8] sm:$0x7] %vm513_vm4, %v1829_v0  ;;  %v2296_v2 = vpop.f32.mrb[47].mxu1 }
 0x27c PF: > { %p19_p11 = scmp.ge.s32.totalorder %s2579_s26, 4   ;;  %s3054_s21 = smov %s2504_s22 }
 0x27d   : > { %s3055_s22 = smov %s2508_s23  ;;  %s3056_s23 = smov %s2589_s29 }
 0x27e   : > { %s3057_s24 = smov %s2579_s26  ;;  %21 = sbr.rel (!%p19_p11) target bundleno = 7 (0x7), region = 114 }
 0x285   :  { %1858 = vsyncpa [#allocation3], 1 }
 0x286   :  { %1860 = vsyncpa [#allocation3 + $0x1], 1 }
 0x287   :  { %1861 = vsyncpa [#allocation5], 1 }
 0x288   :  { %1863 = vsyncpa [#allocation5 + $0x1], 1 }

// kernel: up_forward.3
= control target key start
LH: loop header
LB: loop body
LE: loop exit
PB: predicated region body
PF: predicated region fallthrough
CT: control target
= control target key end

     0   :  { %s3752_s27 = smov 0   ;;  %s4059_s0 = inlined_call_operand.vmem [shape: f32[2,8,342], index: 0, kind: input, shape index: {}]   ;;  %s4060_s1 = inlined_call_operand.vmem [shape: f32[9,4,8], index: 1, kind: input, shape index: {}]   ;;  %s4061_s2 = inlined_call_operand.vmem [shape: f32[4,1], index: 2, kind: input, shape index: {}]   ;;  %s4062_s3 = inlined_call_operand.vmem [shape: f32[4,1], index: 3, kind: input, shape index: {}]   ;;  %s4063_s4 = inlined_call_operand.vmem [shape: f32[9,4,4], index: 4, kind: input, shape index: {}]   ;;  %s4064_s5 = inlined_call_operand.vmem [shape: f32[4,1], index: 5, kind: input, shape index: {}]   ;;  %s4065_s6 = inlined_call_operand.vmem [shape: f32[4,1], index: 6, kind: input, shape index: {}]   ;;  %s4066_s7 = inlined_call_operand.vmem [shape: f32[1,288], index: 7, kind: input, shape index: {}]   ;;  %s4067_s8 = inlined_call_operand.vmem [shape: f32[2,4,288], index: 8, kind: output, shape index: {}]  }
   0x1 LB: > { %s3384_s28 = sadd.s32 4294967295, %s3693_s27   ;;  %p3388_p0 = scmp.ge.s32.totalorder %s3693_s27, 1  ;;  %s3693_s27 = sphi %s3752_s27, %s18_s27  }
   0x2   : > { %p262_p1 = scmp.lt.s32.totalorder %s3693_s27, 3 }
   0x4   : > { %p263_p2 = pnand %p3388_p0, %p262_p1 }
   0x5   : > { %p296_p3 = scmp.lt.s32.totalorder (!%p263_p2), %s3384_s28, 1  ;;  %v3695_v0 = vmov (!%p263_p2), 0.0   ;;  %vm3696_vm0 = vmmov (!%p263_p2), 0   ;;  %s3697_s11 = smov (!%p263_p2), 127   ;;  %v1743_v4 = vld [vmem:[%s4061_s2] sm:$0xf] (!%p263_p2)  ;;  %v1766_v56 = vlaneseq (!%p263_p2) }
   0x6   : > { %266 = sbr.rel (%p263_p2) target bundleno = 962 (0x3c2), region = 52  ;;  %3508 = vmatprep.subr.mxu1 (!%p263_p2), %v3695_v0  ;;  %1784 = vst [vmem:[#allocation2] sm:$0xff] (!%p263_p2), %v3695_v0  ;;  %3510 = vmatprep.mubr.msk.f32.mxu1 (!%p263_p2), %vm3696_vm0, %v3695_v0  ;;  %s3698_s12 = smov (!%p263_p2), 126   ;;  %v1752_v5 = vld [vmem:[%s4062_s3] sm:$0xf] (!%p263_p2)  ;;  %v3705_v6 = vmov (!%p263_p2), 0  }
   0x7   : > { %395 = vmatprep.mubr.f32.mxu0 (!%p263_p2), %v3695_v0  ;;  %s3699_s13 = smov (!%p263_p2), 110   ;;  %s3700_s14 = smov (!%p263_p2), 109   ;;  %3684 = vset.pattern.permute.xlu0 (!%p263_p2), %v3705_v6  ;;  %vm321_vm1 = vcmask (!%p263_p2), 1039360   ;;  %v3391_v9 = vld [vmem:[%s4060_s1 + $0x4] sm:$0xf] (!%p263_p2)  ;;  %vm327_vm2 = vcmask (!%p263_p2), 64512  }
   0x8   : > { %s3701_s15 = smov (!%p263_p2), 108   ;;  %s3702_s16 = smov (!%p263_p2), 92   ;;  %3685 = vset.pattern.permute.xlu1 (!%p263_p2), %v3705_v6  ;;  %vm624_vm3 = vcmask (!%p263_p2), 1031168   ;;  %v306_v17 = vld [vmem:[%s4060_s1] sm:$0xf] (!%p263_p2)  ;;  %vm785_vm4 = vcmask (!%p263_p2), 900096  }
   0x9   : > { %s3703_s17 = smov (!%p263_p2), 91   ;;  %s3704_s18 = smov (!%p263_p2), 90   ;;  %v3396_v24 = vld [vmem:[%s4060_s1 + $0x8] sm:$0xf] (!%p263_p2)  ;;  %vm946_vm5 = vcmask (!%p263_p2), 891904   ;;  %vm1107_vm6 = vcmask (!%p263_p2), 883712  }
   0xa   : > { %v3399_v30 = vld [vmem:[%s4060_s1 + $0xc] sm:$0xf] (!%p263_p2)  ;;  %v3402_v36 = vld [vmem:[%s4060_s1 + $0x10] sm:$0xf] (!%p263_p2)  ;;  %vm1268_vm7 = vcmask (!%p263_p2), 752640   ;;  %vm1429_vm8 = vcmask (!%p263_p2), 744448  }
   0xb   : > { %v3405_v42 = vld [vmem:[%s4060_s1 + $0x14] sm:$0xf] (!%p263_p2)  ;;  %v3408_v47 = vld [vmem:[%s4060_s1 + $0x18] sm:$0xf] (!%p263_p2)  ;;  %vm1590_vm9 = vcmask (!%p263_p2), 736256   ;;  %v1767_v57 = vshrl.u32 (!%p263_p2), %v1766_v56, 7 }
   0xc   : > { %v3411_v53 = vld [vmem:[%s4060_s1 + $0x1c] sm:$0xf] (!%p263_p2)  ;;  %v3414_v55 = vld [vmem:[%s4060_s1 + $0x20] sm:$0xf] (!%p263_p2)  ;;  %vm1785_vm10 = vcmask (!%p263_p2), 699392   ;;  %s3706_s19 = smov (!%p263_p2), 19  }
   0xd   : > { %s4069_s28 = smov (!%p296_p3, %s3384_s28), 1  ;;  %1786 = vst.msk [vmem:[#allocation2 + $0x8] sm:$0xf] %vm1785_vm10, %v3695_v0  ;;  %v1776_v59 = vsub.s32 2, %v1767_v57  ;;  %v1764_v62 = vld [vmem:[%s4066_s7] sm:$0x7] }
   0xe   : > { %s3662_s29 = smul.u32 24, %s4069_s28  ;;  %vm1801_vm11 = vcmask 1043608   ;;  %vm1802_vm12 = vcmask 1047556   ;;  %vm1796_vm13 = vcmask 154624   ;;  %vm1805_vm15 = vcmask 412672  }
   0xf   : > { %vm1803_vm14 = vmor %vm1802_vm12, %vm1801_vm11  ;;  %vm1823_vm10 = vcmask 31744  }
  0x10   : > { %s300_s10 = scalar_lea.vmem %s4059_s0, %s3662_s29 }
  0x11   : > { %v308_v1 = vld [vmem:[%s300_s10 + $0x8] sm:$0xff]  ;;  %v307_v2 = vld [vmem:[%s300_s10] sm:$0xff]  ;;  %v309_v3 = vld [vmem:[%s300_s10 + $0x10] sm:$0xff] }
  0x12   : > { %317 = vrot.lane.b32.xlu0 %v308_v1, %s3697_s11  ;;  %315 = vrot.lane.b32.xlu1 %v307_v2, %s3697_s11 }
  0x16   : > { %319 = vrot.lane.b32.xlu0 %v309_v3, %s3697_s11  ;;  %620 = vrot.lane.b32.xlu1 %v308_v1, %s3698_s12 }
  0x1a   : > { %622 = vrot.lane.b32.xlu0 %v309_v3, %s3698_s12  ;;  %618 = vrot.lane.b32.xlu1 %v307_v2, %s3698_s12 }
  0x1e   : > { %781 = vrot.lane.b32.xlu0 %v308_v1, %s3699_s13  ;;  %783 = vrot.lane.b32.xlu1 %v309_v3, %s3699_s13 }
  0x22   : > { %779 = vrot.lane.b32.xlu0 %v307_v2, %s3699_s13  ;;  %942 = vrot.lane.b32.xlu1 %v308_v1, %s3700_s14 }
  0x26   : > { %944 = vrot.lane.b32.xlu0 %v309_v3, %s3700_s14  ;;  %940 = vrot.lane.b32.xlu1 %v307_v2, %s3700_s14 }
  0x2a   : > { %1103 = vrot.lane.b32.xlu0 %v308_v1, %s3701_s15  ;;  %1105 = vrot.lane.b32.xlu1 %v309_v3, %s3701_s15 }
  0x2e   : > { %1101 = vrot.lane.b32.xlu0 %v307_v2, %s3701_s15  ;;  %1264 = vrot.lane.b32.xlu1 %v308_v1, %s3702_s16 }
  0x32   : > { %1266 = vrot.lane.b32.xlu0 %v309_v3, %s3702_s16  ;;  %1262 = vrot.lane.b32.xlu1 %v307_v2, %s3702_s16 }
  0x36   : > { %1425 = vrot.lane.b32.xlu0 %v308_v1, %s3703_s17  ;;  %1427 = vrot.lane.b32.xlu1 %v309_v3, %s3703_s17 }
  0x3a   : > { %1423 = vrot.lane.b32.xlu0 %v307_v2, %s3703_s17  ;;  %1586 = vrot.lane.b32.xlu1 %v308_v1, %s3704_s18 }
  0x3e   : > { %1588 = vrot.lane.b32.xlu0 %v309_v3, %s3704_s18  ;;  %1584 = vrot.lane.b32.xlu1 %v307_v2, %s3704_s18 }
  0x42   : > { %1746 = vperm.xlu0 %3684, %v1743_v4   ;;  %1755 = vperm.xlu1 %3685, %v1752_v5   ;;  %v1772_v4 = vsub.s32 1, %v1767_v57 }
  0x84   : > { %v318_v7 = vpop.permute.xlu0 %317  ;;  %v316_v8 = vpop.permute.xlu1 %315 }
  0x85   : > { %v322_v13 = vsel %vm321_vm1, %v316_v8, %v318_v7  ;;  %v1777_v8 = vrot.slane %v1764_v62, %v1776_v59 }
  0x88   : > { %v320_v10 = vpop.permute.xlu0 %319  ;;  %v621_v11 = vpop.permute.xlu1 %620 }
  0x89   : > { %3509 = vmatpush3.msra.mxu1 %v320_v10  ;;  %v323_v12 = vsel %vm321_vm1, %v318_v7, %v320_v10 }
  0x8a   : > { %331 = vmatprep.subr.mxu0 %v323_v12  ;;  %3511 = vmatmul.mubr.msk.f32.vlgmr.msra.gmra.mrb[0].mxu1 %vm327_vm2, %v3391_v9 }
  0x8b   : > { %332 = vmatpush1.msra.mxu0 %v322_v13  ;;  %3513 = vmatprep.subr.mxu1 %v3695_v0 }
  0x8c   : > { %3392 = vmatmul.mubr.msk.f32.vlgmr.msra.gmra.mrb[0].mxu0 %vm327_vm2, %v3391_v9  ;;  %475 = vmatprep.subr.mxu0 %v308_v1  ;;  %v623_v14 = vpop.permute.xlu0 %622  ;;  %v619_v15 = vpop.permute.xlu1 %618 }
  0x8d   : > { %476 = vmatpush1.msra.mxu0 %v307_v2  ;;  %3514 = vmatpush3.msra.mxu1 %v309_v3  ;;  %v626_v16 = vsel %vm624_vm3, %v621_v11, %v623_v14  ;;  %v625_v20 = vsel %vm624_vm3, %v619_v15, %v621_v11  ;;  %v1768_v2 = vsub.s32 0, %v1767_v57  ;;  %v3434_v57 = vld [vmem:[%s4063_s4 + $0xc] sm:$0xf] }
  0x8e   : > { %3515 = vmatprep.mubr.msk.f32.mxu1 %vm3696_vm0, %v3695_v0  ;;  %539 = vmatprep.mubr.f32.mxu0 %v3695_v0 }
  0x8f   : > { %633 = vmatprep.subr.mxu0 %v626_v16  ;;  %3518 = vmatprep.subr.mxu1 %v3695_v0  ;;  %v1769_v12 = vrot.slane %v1764_v62, %v1768_v2 }
  0x90   : > { %v782_v18 = vpop.permute.xlu0 %781  ;;  %v784_v19 = vpop.permute.xlu1 %783 }
  0x91   : > { %v787_v21 = vsel %vm785_vm4, %v782_v18, %v784_v19 }
  0x92   : > { %3516 = vmatmul.mubr.msk.f32.vlgmr.msra.gmra.mrb[0].mxu1 %vm327_vm2, %v306_v17 }
  0x93   : > { %3519 = vmatpush3.msra.mxu1 %v623_v14  ;;  %3520 = vmatprep.mubr.msk.f32.mxu1 %vm3696_vm0, %v3695_v0  ;;  %v1773_v14 = vrot.slane %v1764_v62, %v1772_v4 }
  0x94   : > { %3394 = vmatmul.mubr.msk.f32.vlgmr.msra.gmra.mrb[0].mxu0 %vm327_vm2, %v306_v17  ;;  %v780_v22 = vpop.permute.xlu0 %779  ;;  %3523 = vmatprep.subr.mxu1 %v3695_v0  ;;  %v943_v23 = vpop.permute.xlu1 %942 }
  0x95   : > { %634 = vmatpush1.msra.mxu0 %v625_v20  ;;  %697 = vmatprep.mubr.f32.mxu0 %v3695_v0  ;;  %v786_v26 = vsel %vm785_vm4, %v780_v22, %v782_v18 }
  0x96   : > { %794 = vmatprep.subr.mxu0 %v787_v21 }
  0x98   : > { %v945_v25 = vpop.permute.xlu0 %944  ;;  %v941_v28 = vpop.permute.xlu1 %940 }
  0x99   : > { %v948_v27 = vsel %vm946_vm5, %v943_v23, %v945_v25  ;;  %v947_v32 = vsel %vm946_vm5, %v941_v28, %v943_v23 }
  0x9a   : > { %3521 = vmatmul.mubr.msk.f32.vlgmr.msra.gmra.mrb[0].mxu1 %vm327_vm2, %v3396_v24 }
  0x9b   : > { %3524 = vmatpush3.msra.mxu1 %v784_v19  ;;  %3525 = vmatprep.mubr.msk.f32.mxu1 %vm3696_vm0, %v3695_v0 }
  0x9c   : > { %3397 = vmatmul.mubr.msk.f32.vlgmr.msra.gmra.mrb[0].mxu0 %vm327_vm2, %v3396_v24  ;;  %3528 = vmatprep.subr.mxu1 %v3695_v0  ;;  %v1104_v29 = vpop.permute.xlu0 %1103  ;;  %v1106_v31 = vpop.permute.xlu1 %1105 }
  0x9d   : > { %795 = vmatpush1.msra.mxu0 %v786_v26  ;;  %858 = vmatprep.mubr.f32.mxu0 %v3695_v0  ;;  %v1109_v33 = vsel %vm1107_vm6, %v1104_v29, %v1106_v31 }
  0x9e   : > { %955 = vmatprep.subr.mxu0 %v948_v27 }
  0xa0   : > { %v1102_v34 = vpop.permute.xlu0 %1101  ;;  %v1265_v35 = vpop.permute.xlu1 %1264 }
  0xa1   : > { %v1108_v38 = vsel %vm1107_vm6, %v1102_v34, %v1104_v29 }
  0xa2   : > { %3526 = vmatmul.mubr.msk.f32.vlgmr.msra.gmra.mrb[0].mxu1 %vm327_vm2, %v3399_v30 }
  0xa3   : > { %3529 = vmatpush3.msra.mxu1 %v945_v25  ;;  %3530 = vmatprep.mubr.msk.f32.mxu1 %vm3696_vm0, %v3695_v0 }
  0xa4   : > { %3400 = vmatmul.mubr.msk.f32.vlgmr.msra.gmra.mrb[0].mxu0 %vm327_vm2, %v3399_v30  ;;  %3533 = vmatprep.subr.mxu1 %v3695_v0  ;;  %v1267_v37 = vpop.permute.xlu0 %1266  ;;  %v1263_v40 = vpop.permute.xlu1 %1262 }
  0xa5   : > { %956 = vmatpush1.msra.mxu0 %v947_v32  ;;  %1019 = vmatprep.mubr.f32.mxu0 %v3695_v0  ;;  %v1270_v39 = vsel %vm1268_vm7, %v1265_v35, %v1267_v37  ;;  %v1269_v44 = vsel %vm1268_vm7, %v1263_v40, %v1265_v35 }
  0xa6   : > { %1116 = vmatprep.subr.mxu0 %v1109_v33 }
  0xa8   : > { %v1426_v41 = vpop.permute.xlu0 %1425  ;;  %v1428_v43 = vpop.permute.xlu1 %1427 }
  0xa9   : > { %v1431_v45 = vsel %vm1429_vm8, %v1426_v41, %v1428_v43 }
  0xaa   : > { %3531 = vmatmul.mubr.msk.f32.vlgmr.msra.gmra.mrb[0].mxu1 %vm327_vm2, %v3402_v36 }
  0xab   : > { %3534 = vmatpush3.msra.mxu1 %v1106_v31  ;;  %3535 = vmatprep.mubr.msk.f32.mxu1 %vm3696_vm0, %v3695_v0 }
  0xac   : > { %3403 = vmatmul.mubr.msk.f32.vlgmr.msra.gmra.mrb[0].mxu0 %vm327_vm2, %v3402_v36  ;;  %3538 = vmatprep.subr.mxu1 %v3695_v0  ;;  %v1424_v46 = vpop.permute.xlu0 %1423  ;;  %v1587_v49 = vpop.permute.xlu1 %1586  ;;  %v3310_v36 = vld [vmem:[%s4065_s6] sm:$0xf] }
  0xad   : > { %1117 = vmatpush1.msra.mxu0 %v1108_v38  ;;  %1180 = vmatprep.mubr.f32.mxu0 %v3695_v0  ;;  %v1430_v50 = vsel %vm1429_vm8, %v1424_v46, %v1426_v41  ;;  %v3417_v38 = vld [vmem:[%s4063_s4 + $0x4] sm:$0xf] }
  0xae   : > { %1277 = vmatprep.subr.mxu0 %v1270_v39 }
  0xb0   : > { %v1589_v48 = vpop.permute.xlu0 %1588  ;;  %v1585_v52 = vpop.permute.xlu1 %1584 }
  0xb1   : > { %v1592_v51 = vsel %vm1590_vm9, %v1587_v49, %v1589_v48  ;;  %v1591_v54 = vsel %vm1590_vm9, %v1585_v52, %v1587_v49 }
  0xb2   : > { %3536 = vmatmul.mubr.msk.f32.vlgmr.msra.gmra.mrb[0].mxu1 %vm327_vm2, %v3405_v42 }
  0xb3   : > { %3539 = vmatpush3.msra.mxu1 %v1267_v37  ;;  %3540 = vmatprep.mubr.msk.f32.mxu1 %vm3696_vm0, %v3695_v0  ;;  %v3301_v37 = vld [vmem:[%s4064_s5] sm:$0xf] }
  0xb4   : > { %3406 = vmatmul.mubr.msk.f32.vlgmr.msra.gmra.mrb[0].mxu0 %vm327_vm2, %v3405_v42  ;;  %3543 = vmatprep.subr.mxu1 %v3695_v0 }
  0xb5   : > { %1278 = vmatpush1.msra.mxu0 %v1269_v44  ;;  %1341 = vmatprep.mubr.f32.mxu0 %v3695_v0 }
  0xb6   : > { %1438 = vmatprep.subr.mxu0 %v1431_v45  ;;  %v1807_v45 = vld [vmem:[%s4063_s4] sm:$0xf] }
  0xba   : > { %3541 = vmatmul.mubr.msk.f32.vlgmr.msra.gmra.mrb[0].mxu1 %vm327_vm2, %v3408_v47 }
  0xbb   : > { %3544 = vmatpush3.msra.mxu1 %v1428_v43  ;;  %3545 = vmatprep.mubr.msk.f32.mxu1 %vm3696_vm0, %v3695_v0 }
  0xbc   : > { %3409 = vmatmul.mubr.msk.f32.vlgmr.msra.gmra.mrb[0].mxu0 %vm327_vm2, %v3408_v47  ;;  %3548 = vmatprep.subr.mxu1 %v3695_v0 }
  0xbd   : > { %1439 = vmatpush1.msra.mxu0 %v1430_v50  ;;  %1502 = vmatprep.mubr.f32.mxu0 %v3695_v0 }
  0xbe   : > { %1599 = vmatprep.subr.mxu0 %v1592_v51  ;;  %v3428_v51 = vld [vmem:[%s4063_s4 + $0x8] sm:$0xf] }
  0xc1   : > { %v1747_v58 = vpop.permute.xlu0 %1746  ;;  %v1756_v61 = vpop.permute.xlu1 %1755 }
  0xc2   : > { %3546 = vmatmul.mubr.msk.f32.vlgmr.msra.gmra.mrb[0].mxu1 %vm327_vm2, %v3411_v53 }
  0xc3   : > { %3549 = vmatpush3.msra.mxu1 %v1589_v48  ;;  %3550 = vmatprep.mubr.msk.f32.mxu1 %vm3696_vm0, %v3695_v0 }
  0xc4   : > { %3412 = vmatmul.mubr.msk.f32.vlgmr.msra.gmra.mrb[0].mxu0 %vm327_vm2, %v3411_v53  ;;  %3553 = vmatprep.subr.mxu1 %v3695_v0 }
  0xc5   : > { %1600 = vmatpush1.msra.mxu0 %v1591_v54  ;;  %1663 = vmatprep.mubr.f32.mxu0 %v3695_v0 }
  0xca   : > { %3551 = vmatmul.mubr.msk.f32.vlgmr.msra.gmra.mrb[0].mxu1 %vm327_vm2, %v3414_v55 }
  0xcb   : > { %3555 = vmatprep.mubr.msk.f32.mxu1 %vm3696_vm0, %v3695_v0 }
  0xcc   : > { %3415 = vmatmul.mubr.msk.f32.vlgmr.msra.gmra.mrb[0].mxu0 %vm327_vm2, %v3414_v55  ;;  %vm1827_vm2 = vcmask 1043456  }
  0xcd   : > { %1898 = vmatprep.mubr.f32.mxu0 %v3695_v0 }
 0x19d   : > { %v1736_v60 = vpop.f32.mrb[0].mxu1 }
 0x19e   : > { %v1751_v63 = vmul.f32 %v1747_v58, %v1736_v60  ;;  %v3552_v1 = vpop.f32.mrb[1].mxu1 }
 0x19f   : > { %v1665_v3 = vpop.f32.mrb[0].mxu0  ;;  %v3440_v1 = vld [vmem:[%s4063_s4 + $0x10] sm:$0xf] }
 0x1a0   : > { %v1749_v5 = vmul.f32 %v1747_v58, %v1665_v3  ;;  %v1760_v6 = vadd.f32 %v1756_v61, %v1751_v63  ;;  %v1667_v7 = vpop.f32.mrb[1].mxu0 }
 0x1a1   : > { %v1750_v9 = vmul.f32 %v1747_v58, %v1667_v7 }
 0x1a2   : > { %v1758_v10 = vadd.f32 %v1756_v61, %v1749_v5  ;;  %v1763_v11 = vmax.f32 %v1760_v6, 0.0  ;;  %v3446_v6 = vld [vmem:[%s4063_s4 + $0x14] sm:$0xf] }
 0x1a3   : > { %v1759_v13 = vadd.f32 %v1756_v61, %v1750_v9 }
 0x1a4   : > { %v1761_v15 = vmax.f32 %v1758_v10, 0.0  ;;  %v1783_v16 = vmul.f32 %v1777_v8, %v1763_v11  ;;  %v3452_v11 = vld [vmem:[%s4063_s4 + $0x18] sm:$0xf] }
 0x1a5   : > { %v1762_v17 = vmax.f32 %v1759_v13, 0.0 }
 0x1a6   : > { %1793 = vrot.lane.b32.xlu0 %v1783_v16, %s3706_s19  ;;  %v1781_v18 = vmul.f32 %v1769_v12, %v1761_v15 }
 0x1a7   : > { %v1782_v19 = vmul.f32 %v1773_v14, %v1762_v17  ;;  %v3458_v17 = vld [vmem:[%s4063_s4 + $0x1c] sm:$0xf] }
 0x1a9   : > { %v1790_v20 = vcombine.low %v1781_v18, %v1782_v19 }
 0x1ab   : > { %1791 = vrot.lane.b32.xlu1 %v1790_v20, %s3706_s19 }
 0x218   : > { %v1794_v23 = vpop.permute.xlu0 %1793 }
 0x21d   : > { %v1792_v21 = vpop.permute.xlu1 %1791 }
 0x21e   : > { %v1795_v22 = vrot.slane %v1792_v21, 4 }
 0x220   : > { %v1797_v24 = vsel %vm1796_vm13, %v1795_v22, %v1792_v21  ;;  %v1798_v25 = vsel %vm1796_vm13, %v1795_v22, %v1794_v23  ;;  %v3464_v22 = vld [vmem:[%s4063_s4 + $0x20] sm:$0xf] }
 0x221   : > { %1804 = vst.msk [vmem:[#allocation2] sm:$0xff] %vm1803_vm14, %v1797_v24 }
 0x222   : > { %1806 = vst.msk [vmem:[#allocation2 + $0x8] sm:$0xf] %vm1805_vm15, %v1798_v25 }
 0x228   : > { %v1808_v27 = vld [vmem:[#allocation2] sm:$0xff] }
 0x229   : > { %v1809_v26 = vld [vmem:[#allocation2 + $0x8] sm:$0xf]  ;;  %v1814_v28 = vcombine.high %v1808_v27, %v1808_v27 }
 0x22a   : > { %1819 = vrot.lane.b32.xlu0 %v1809_v26, %s3697_s11  ;;  %v2128_v29 = vld [vmem:[#allocation2 + $0x8] sm:$0xf] }
 0x22b   : > { %1817 = vrot.lane.b32.xlu1 %v1814_v28, %s3697_s11  ;;  %v2296_v30 = vld [vmem:[#allocation2 + $0x8] sm:$0xf] }
 0x22c   : > { %v2464_v31 = vld [vmem:[#allocation2 + $0x8] sm:$0xf] }
 0x22d   : > { %v2632_v32 = vld [vmem:[#allocation2 + $0x8] sm:$0xf] }
 0x22e   : > { %2134 = vrot.lane.b32.xlu0 %v1814_v28, %s3698_s12  ;;  %v2800_v33 = vld [vmem:[#allocation2 + $0x8] sm:$0xf] }
 0x22f   : > { %1815 = vrot.lane.b32.xlu1 %v1808_v27, %s3697_s11  ;;  %v2968_v34 = vld [vmem:[#allocation2 + $0x8] sm:$0xf] }
 0x230   : > { %v3136_v35 = vld [vmem:[#allocation2 + $0x8] sm:$0xf] }
 0x232   : > { %2132 = vrot.lane.b32.xlu0 %v1808_v27, %s3698_s12 }
 0x233   : > { %2136 = vrot.lane.b32.xlu1 %v2128_v29, %s3698_s12 }
 0x236   : > { %2304 = vrot.lane.b32.xlu0 %v2296_v30, %s3699_s13 }
 0x237   : > { %2302 = vrot.lane.b32.xlu1 %v1814_v28, %s3699_s13 }
 0x23a   : > { %2470 = vrot.lane.b32.xlu0 %v1814_v28, %s3700_s14 }
 0x23b   : > { %2300 = vrot.lane.b32.xlu1 %v1808_v27, %s3699_s13  ;;  %s3663_s13 = smul.u32 12, %s4069_s28 }
 0x23e   : > { %2468 = vrot.lane.b32.xlu0 %v1808_v27, %s3700_s14 }
 0x23f   : > { %2472 = vrot.lane.b32.xlu1 %v2464_v31, %s3700_s14 }
 0x242   : > { %2640 = vrot.lane.b32.xlu0 %v2632_v32, %s3701_s15 }
 0x243   : > { %2638 = vrot.lane.b32.xlu1 %v1814_v28, %s3701_s15 }
 0x246   : > { %2806 = vrot.lane.b32.xlu0 %v1814_v28, %s3702_s16 }
 0x247   : > { %2636 = vrot.lane.b32.xlu1 %v1808_v27, %s3701_s15 }
 0x24a   : > { %2804 = vrot.lane.b32.xlu0 %v1808_v27, %s3702_s16 }
 0x24b   : > { %2808 = vrot.lane.b32.xlu1 %v2800_v33, %s3702_s16  ;;  %s305_s16 = scalar_lea.vmem %s4067_s8, %s3663_s13 }
 0x24e   : > { %2976 = vrot.lane.b32.xlu0 %v2968_v34, %s3703_s17 }
 0x24f   : > { %2974 = vrot.lane.b32.xlu1 %v1814_v28, %s3703_s17 }
 0x252   : > { %3142 = vrot.lane.b32.xlu0 %v1814_v28, %s3704_s18 }
 0x253   : > { %2972 = vrot.lane.b32.xlu1 %v1808_v27, %s3703_s17 }
 0x256   : > { %3140 = vrot.lane.b32.xlu0 %v1808_v27, %s3704_s18 }
 0x257   : > { %3144 = vrot.lane.b32.xlu1 %v3136_v35, %s3704_s18 }
 0x25a   : > { %3313 = vperm.xlu0 %3684, %v3310_v36  }
 0x25b   : > { %3304 = vperm.xlu1 %3685, %v3301_v37  }
 0x29c   : > { %v1820_v39 = vpop.permute.xlu0 %1819 }
 0x29d   : > { %3554 = vmatpush3.msk.msra.mxu1 %vm1827_vm2, %v1820_v39  ;;  %v1818_v40 = vpop.permute.xlu1 %1817 }
 0x29e   : > { %3556 = vmatmul.mubr.msk.f32.vlgmr.msra.gmra.mrb[2].mxu1 %vm1823_vm10, %v3417_v38  ;;  %3558 = vmatprep.subr.mxu1 %v3695_v0  ;;  %v1822_v41 = vsel %vm321_vm1, %v1818_v40, %v1820_v39 }
 0x29f   : > { %3559 = vmatpush3.msk.msra.mxu1 %vm1827_vm2, %v1809_v26  ;;  %3560 = vmatprep.mubr.msk.f32.mxu1 %vm3696_vm0, %v3695_v0 }
 0x2a0   : > { %v2135_v42 = vpop.permute.xlu0 %2134  ;;  %3418 = vmatprep.subr.msk.mxu0 %vm1827_vm2, %v1822_v41  ;;  %3563 = vmatprep.subr.mxu1 %v3695_v0 }
 0x2a1   : > { %v1816_v43 = vpop.permute.xlu1 %1815 }
 0x2a2   : > { %v1821_v44 = vsel %vm321_vm1, %v1816_v43, %v1818_v40 }
 0x2a3   : > { %3419 = vmatpush1.msk.msra.mxu0 %vm1827_vm2, %v1821_v44 }
 0x2a4   : > { %v2133_v46 = vpop.permute.xlu0 %2132  ;;  %3420 = vmatmul.mubr.msk.f32.vlgmr.msra.gmra.mrb[2].mxu0 %vm1823_vm10, %v3417_v38  ;;  %3423 = vmatprep.subr.msk.mxu0 %vm1827_vm2, %v1814_v28 }
 0x2a5   : > { %3424 = vmatpush1.msk.msra.mxu0 %vm1827_vm2, %v1808_v27  ;;  %v2137_v47 = vpop.permute.xlu1 %2136  ;;  %2048 = vmatprep.mubr.f32.mxu0 %v3695_v0  ;;  %v2138_v52 = vsel %vm624_vm3, %v2133_v46, %v2135_v42 }
 0x2a6   : > { %3561 = vmatmul.mubr.msk.f32.vlgmr.msra.gmra.mrb[2].mxu1 %vm1823_vm10, %v1807_v45  ;;  %v2139_v48 = vsel %vm624_vm3, %v2135_v42, %v2137_v47 }
 0x2a7   : > { %3564 = vmatpush3.msk.msra.mxu1 %vm1827_vm2, %v2137_v47  ;;  %3429 = vmatprep.subr.msk.mxu0 %vm1827_vm2, %v2139_v48 }
 0x2a8   : > { %3565 = vmatprep.mubr.msk.f32.mxu1 %vm3696_vm0, %v3695_v0  ;;  %v2305_v49 = vpop.permute.xlu0 %2304  ;;  %3568 = vmatprep.subr.mxu1 %v3695_v0 }
 0x2a9   : > { %v2303_v50 = vpop.permute.xlu1 %2302 }
 0x2aa   : > { %v2307_v53 = vsel %vm785_vm4, %v2303_v50, %v2305_v49 }
 0x2ac   : > { %3425 = vmatmul.mubr.msk.f32.vlgmr.msra.gmra.mrb[2].mxu0 %vm1823_vm10, %v1807_v45  ;;  %v2471_v55 = vpop.permute.xlu0 %2470 }
 0x2ad   : > { %3430 = vmatpush1.msk.msra.mxu0 %vm1827_vm2, %v2138_v52  ;;  %v2301_v54 = vpop.permute.xlu1 %2300  ;;  %2213 = vmatprep.mubr.f32.mxu0 %v3695_v0 }
 0x2ae   : > { %3566 = vmatmul.mubr.msk.f32.vlgmr.msra.gmra.mrb[2].mxu1 %vm1823_vm10, %v3428_v51  ;;  %3435 = vmatprep.subr.msk.mxu0 %vm1827_vm2, %v2307_v53  ;;  %v2306_v58 = vsel %vm785_vm4, %v2301_v54, %v2303_v50 }
 0x2af   : > { %3569 = vmatpush3.msk.msra.mxu1 %vm1827_vm2, %v2305_v49  ;;  %3570 = vmatprep.mubr.msk.f32.mxu1 %vm3696_vm0, %v3695_v0 }
 0x2b0   : > { %3573 = vmatprep.subr.mxu1 %v3695_v0  ;;  %v2469_v59 = vpop.permute.xlu0 %2468 }
 0x2b1   : > { %v2473_v56 = vpop.permute.xlu1 %2472  ;;  %v2474_v2 = vsel %vm946_vm5, %v2469_v59, %v2471_v55 }
 0x2b2   : > { %v2475_v60 = vsel %vm946_vm5, %v2471_v55, %v2473_v56 }
 0x2b4   : > { %3431 = vmatmul.mubr.msk.f32.vlgmr.msra.gmra.mrb[2].mxu0 %vm1823_vm10, %v3428_v51  ;;  %v2641_v62 = vpop.permute.xlu0 %2640 }
 0x2b5   : > { %3436 = vmatpush1.msk.msra.mxu0 %vm1827_vm2, %v2306_v58  ;;  %v2639_v61 = vpop.permute.xlu1 %2638  ;;  %2381 = vmatprep.mubr.f32.mxu0 %v3695_v0 }
 0x2b6   : > { %3571 = vmatmul.mubr.msk.f32.vlgmr.msra.gmra.mrb[2].mxu1 %vm1823_vm10, %v3434_v57  ;;  %3441 = vmatprep.subr.msk.mxu0 %vm1827_vm2, %v2475_v60  ;;  %v2643_v3 = vsel %vm1107_vm6, %v2639_v61, %v2641_v62 }
 0x2b7   : > { %3574 = vmatpush3.msk.msra.mxu1 %vm1827_vm2, %v2473_v56  ;;  %3575 = vmatprep.mubr.msk.f32.mxu1 %vm3696_vm0, %v3695_v0 }
 0x2b8   : > { %3578 = vmatprep.subr.mxu1 %v3695_v0  ;;  %v2807_v4 = vpop.permute.xlu0 %2806 }
 0x2b9   : > { %v2637_v63 = vpop.permute.xlu1 %2636 }
 0x2ba   : > { %v2642_v7 = vsel %vm1107_vm6, %v2637_v63, %v2639_v61 }
 0x2bc   : > { %3437 = vmatmul.mubr.msk.f32.vlgmr.msra.gmra.mrb[2].mxu0 %vm1823_vm10, %v3434_v57  ;;  %v2805_v9 = vpop.permute.xlu0 %2804 }
 0x2bd   : > { %3442 = vmatpush1.msk.msra.mxu0 %vm1827_vm2, %v2474_v2  ;;  %2549 = vmatprep.mubr.f32.mxu0 %v3695_v0  ;;  %v2809_v5 = vpop.permute.xlu1 %2808  ;;  %v2810_v12 = vsel %vm1268_vm7, %v2805_v9, %v2807_v4 }
 0x2be   : > { %3576 = vmatmul.mubr.msk.f32.vlgmr.msra.gmra.mrb[2].mxu1 %vm1823_vm10, %v3440_v1  ;;  %3447 = vmatprep.subr.msk.mxu0 %vm1827_vm2, %v2643_v3  ;;  %v2811_v8 = vsel %vm1268_vm7, %v2807_v4, %v2809_v5 }
 0x2bf   : > { %3579 = vmatpush3.msk.msra.mxu1 %vm1827_vm2, %v2641_v62  ;;  %3580 = vmatprep.mubr.msk.f32.mxu1 %vm3696_vm0, %v3695_v0 }
 0x2c0   : > { %3583 = vmatprep.subr.mxu1 %v3695_v0  ;;  %v2977_v13 = vpop.permute.xlu0 %2976 }
 0x2c1   : > { %v2975_v10 = vpop.permute.xlu1 %2974 }
 0x2c2   : > { %v2979_v15 = vsel %vm1429_vm8, %v2975_v10, %v2977_v13 }
 0x2c4   : > { %3443 = vmatmul.mubr.msk.f32.vlgmr.msra.gmra.mrb[2].mxu0 %vm1823_vm10, %v3440_v1  ;;  %v3143_v18 = vpop.permute.xlu0 %3142 }
 0x2c5   : > { %3448 = vmatpush1.msk.msra.mxu0 %vm1827_vm2, %v2642_v7  ;;  %2717 = vmatprep.mubr.f32.mxu0 %v3695_v0  ;;  %v2973_v14 = vpop.permute.xlu1 %2972 }
 0x2c6   : > { %3581 = vmatmul.mubr.msk.f32.vlgmr.msra.gmra.mrb[2].mxu1 %vm1823_vm10, %v3446_v6  ;;  %3453 = vmatprep.subr.msk.mxu0 %vm1827_vm2, %v2811_v8  ;;  %v2978_v19 = vsel %vm1429_vm8, %v2973_v14, %v2975_v10 }
 0x2c7   : > { %3584 = vmatpush3.msk.msra.mxu1 %vm1827_vm2, %v2809_v5  ;;  %3585 = vmatprep.mubr.msk.f32.mxu1 %vm3696_vm0, %v3695_v0 }
 0x2c8   : > { %3588 = vmatprep.subr.mxu1 %v3695_v0  ;;  %v3141_v21 = vpop.permute.xlu0 %3140 }
 0x2c9   : > { %v3145_v16 = vpop.permute.xlu1 %3144  ;;  %v3146_v23 = vsel %vm1590_vm9, %v3141_v21, %v3143_v18 }
 0x2ca   : > { %v3147_v20 = vsel %vm1590_vm9, %v3143_v18, %v3145_v16 }
 0x2cc   : > { %3449 = vmatmul.mubr.msk.f32.vlgmr.msra.gmra.mrb[2].mxu0 %vm1823_vm10, %v3446_v6 }
 0x2cd   : > { %3454 = vmatpush1.msk.msra.mxu0 %vm1827_vm2, %v2810_v12  ;;  %2885 = vmatprep.mubr.f32.mxu0 %v3695_v0 }
 0x2ce   : > { %3586 = vmatmul.mubr.msk.f32.vlgmr.msra.gmra.mrb[2].mxu1 %vm1823_vm10, %v3452_v11  ;;  %3459 = vmatprep.subr.msk.mxu0 %vm1827_vm2, %v2979_v15 }
 0x2cf   : > { %3589 = vmatpush3.msk.msra.mxu1 %vm1827_vm2, %v2977_v13  ;;  %3590 = vmatprep.mubr.msk.f32.mxu1 %vm3696_vm0, %v3695_v0 }
 0x2d0   : > { %3593 = vmatprep.subr.mxu1 %v3695_v0 }
 0x2d4   : > { %3455 = vmatmul.mubr.msk.f32.vlgmr.msra.gmra.mrb[2].mxu0 %vm1823_vm10, %v3452_v11 }
 0x2d5   : > { %3460 = vmatpush1.msk.msra.mxu0 %vm1827_vm2, %v2978_v19  ;;  %3053 = vmatprep.mubr.f32.mxu0 %v3695_v0 }
 0x2d6   : > { %3591 = vmatmul.mubr.msk.f32.vlgmr.msra.gmra.mrb[2].mxu1 %vm1823_vm10, %v3458_v17  ;;  %3465 = vmatprep.subr.msk.mxu0 %vm1827_vm2, %v3147_v20 }
 0x2d7   : > { %3594 = vmatpush3.msk.msra.mxu1 %vm1827_vm2, %v3145_v16  ;;  %3595 = vmatprep.mubr.msk.f32.mxu1 %vm3696_vm0, %v3695_v0  ;;  %vm3327_vm0 = vcmask 257024  }
 0x2d9   : > { %v3314_v28 = vpop.permute.xlu0 %3313 }
 0x2da   : > { %v3305_v24 = vpop.permute.xlu1 %3304 }
 0x2dc   : > { %3461 = vmatmul.mubr.msk.f32.vlgmr.msra.gmra.mrb[2].mxu0 %vm1823_vm10, %v3458_v17 }
 0x2dd   : > { %3466 = vmatpush1.msk.msra.mxu0 %vm1827_vm2, %v3146_v23  ;;  %3221 = vmatprep.mubr.f32.mxu0 %v3695_v0 }
 0x2de   : > { %3596 = vmatmul.mubr.msk.f32.vlgmr.msra.gmra.mrb[2].mxu1 %vm1823_vm10, %v3464_v22 }
 0x2e4   : > { %3467 = vmatmul.mubr.msk.f32.vlgmr.msra.gmra.mrb[2].mxu0 %vm1823_vm10, %v3464_v22 }
 0x3b1   : > { %v3294_v25 = vpop.f32.mrb[2].mxu1 }
 0x3b2   : > { %v3309_v26 = vmul.f32 %v3305_v24, %v3294_v25  ;;  %v3597_v27 = vpop.f32.mrb[3].mxu1 }
 0x3b4   : > { %v3318_v29 = vadd.f32 %v3314_v28, %v3309_v26 }
 0x3b6   : > { %v3321_v30 = vmax.f32 %v3318_v29, 0.0 }
 0x3b7   : > { %v3223_v31 = vpop.f32.mrb[2].mxu0 }
 0x3b8   : > { %3328 = vst.msk [vmem:[%s305_s16 + $0x8] sm:$0xf] %vm3327_vm0, %v3321_v30  ;;  %v3307_v32 = vmul.f32 %v3305_v24, %v3223_v31  ;;  %v3225_v33 = vpop.f32.mrb[3].mxu0 }
 0x3b9   : > { %v3308_v0 = vmul.f32 %v3305_v24, %v3225_v33 }
 0x3ba   : > { %v3316_v34 = vadd.f32 %v3314_v28, %v3307_v32 }
 0x3bb   : > { %v3317_v35 = vadd.f32 %v3314_v28, %v3308_v0 }
 0x3bc   : > { %v3319_v36 = vmax.f32 %v3316_v34, 0.0 }
 0x3bd   : > { %v3320_v37 = vmax.f32 %v3317_v35, 0.0 }
 0x3bf   : > { %v3324_v38 = vcombine.low %v3319_v36, %v3320_v37 }
 0x3c1   : > { %3326 = vst [vmem:[%s305_s16] sm:$0xff] %v3324_v38 }
 0x3c2 PF: > { %s18_s27 = sadd.s32 1, %s3693_s27  }
 0x3c3   : > { %p15_p4 = scmp.ge.s32.totalorder %s18_s27, 4  }
 0x3c5   :  { %17 = sbr.rel (!%p15_p4) target bundleno = 1 (0x1), region = 98 }

</bundles_post_ra>
